<compile_context>
chip_gen: v6e
topology: v6e:2x2x1
jax: 0.10.0
libtpu: 0.0.40
codegen_flags: <defaults>
</compile_context>

<pallas_src>
import functools

import jax
import jax.numpy as jnp
from jax import lax
from jax.experimental import pallas as pl
from jax.experimental.pallas import tpu as pltpu


# ------------------------------ Pallas kernel ------------------------------

def _text_rnn_kernel(*refs, seq_len, batch, hidden, num_layers, num_buf_pairs):
    """Whole TextRNN forward in one kernel.

    Ref layout:
      refs[0]                      x        (T*Bp, E) time-major flat input
      for l in range(L-1):         fused bidirectional layer l
        refs[1+4l : 5+4l]          w_ih_f_exp (D,8H), w_ih_b_exp (D,8H),
                                   b_exp (1,8H), w_hh_blk (2H,8H)
      refs[1+4(L-1) : 6+4(L-1)]    last layer: w_ih_f (D,4H), w_hh_f (H,4H),
                                   b_f (1,4H), w_ih_b (D,4H), b_b (1,4H)
      refs[n_in-2], refs[n_in-1]   fc_w (2H,C), fc_b (1,C)
      refs[n_in]                   out (Bp, C)
      refs[n_in+1:]                scratch (only if L>=2):
                                   proj_f (T*Bp,8H), proj_b (T*Bp,8H),
                                   2*num_buf_pairs seq buffers (T*Bp, H)
    """
    T, B, H = seq_len, batch, hidden
    L = num_layers
    n_in = 1 + 4 * (L - 1) + 5 + 2
    x_ref = refs[0]
    fc_w_ref = refs[n_in - 2]
    fc_b_ref = refs[n_in - 1]
    out_ref = refs[n_in]
    scratch = refs[n_in + 1:]
    if L >= 2:
        proj_f_scr = scratch[0]
        proj_b_scr = scratch[1]
        seq_refs = scratch[2:]

    prev_f_ref = prev_b_ref = None

    # ---------------- non-last layers: fused bidirectional LSTM ------------
    for l in range(L - 1):
        w_ih_f_r, w_ih_b_r, b_r, w_blk_r = refs[1 + 4 * l: 5 + 4 * l]

        # Hoisted whole-sequence input projections (bias folded into fwd).
        if l == 0:
            inp = x_ref[...]                                       # (T*Bp, E)
            proj_f_scr[...] = jnp.dot(
                inp, w_ih_f_r[...], preferred_element_type=jnp.float32) + b_r[...]
            proj_b_scr[...] = jnp.dot(
                inp, w_ih_b_r[...], preferred_element_type=jnp.float32)
        else:
            prev_f = prev_f_ref[...]                               # (T*Bp, H)
            prev_b = prev_b_ref[...]
            w_f = w_ih_f_r[...]                                    # (2H, 8H)
            w_b = w_ih_b_r[...]
            proj_f_scr[...] = (
                jnp.dot(prev_f, w_f[0:H, :], preferred_element_type=jnp.float32)
                + jnp.dot(prev_b, w_f[H:2 * H, :], preferred_element_type=jnp.float32)
                + b_r[...])
            proj_b_scr[...] = (
                jnp.dot(prev_f, w_b[0:H, :], preferred_element_type=jnp.float32)
                + jnp.dot(prev_b, w_b[H:2 * H, :], preferred_element_type=jnp.float32))

        w_blk = w_blk_r[...]                                       # (2H, 8H)
        pair = l % num_buf_pairs
        sf = seq_refs[2 * pair]
        sb = seq_refs[2 * pair + 1]

        # Combined state hc = [h_fwd | h_bwd]; one MXU matmul per step, the
        # backward direction just indexes time in reverse (rt = T-1-t).
        hc = jnp.zeros((B, 2 * H), jnp.float32)
        cc = jnp.zeros((B, 2 * H), jnp.float32)
        for t in range(T):
            rt = T - 1 - t
            pre = (proj_f_scr[t * B:(t + 1) * B, :]
                   + proj_b_scr[rt * B:(rt + 1) * B, :])
            gates = pre + jnp.dot(hc, w_blk, preferred_element_type=jnp.float32)
            i = jax.nn.sigmoid(gates[:, 0:2 * H])
            f = jax.nn.sigmoid(gates[:, 2 * H:4 * H])
            g = jnp.tanh(gates[:, 4 * H:6 * H])
            o = jax.nn.sigmoid(gates[:, 6 * H:8 * H])
            cc = f * cc + i * g
            hc = o * jnp.tanh(cc)
            sf[t * B:(t + 1) * B, :] = hc[:, 0:H]        # fwd half at time t
            sb[rt * B:(rt + 1) * B, :] = hc[:, H:2 * H]  # bwd half at time rt
        prev_f_ref, prev_b_ref = sf, sb

    # ---------------- last layer: forward recurrence + 1 backward step -----
    # FC only reads out[:, -1, :] == [h_fwd after step T-1,
    #                                 h_bwd after its FIRST step (zero init)].
    base = 1 + 4 * (L - 1)
    w_ih_f_r, w_hh_f_r, b_f_r, w_ih_b_r, b_b_r = refs[base:base + 5]

    if L == 1:
        inp = x_ref[...]
        proj_f = jnp.dot(inp, w_ih_f_r[...],
                         preferred_element_type=jnp.float32) + b_f_r[...]
        gb = jnp.dot(inp[(T - 1) * B:T * B, :], w_ih_b_r[...],
                     preferred_element_type=jnp.float32) + b_b_r[...]
    else:
        prev_f = prev_f_ref[...]
        prev_b = prev_b_ref[...]
        w_f = w_ih_f_r[...]                                        # (2H, 4H)
        w_b = w_ih_b_r[...]
        proj_f = (jnp.dot(prev_f, w_f[0:H, :], preferred_element_type=jnp.float32)
                  + jnp.dot(prev_b, w_f[H:2 * H, :], preferred_element_type=jnp.float32)
                  + b_f_r[...])
        gb = (jnp.dot(prev_f[(T - 1) * B:T * B, :], w_b[0:H, :],
                      preferred_element_type=jnp.float32)
              + jnp.dot(prev_b[(T - 1) * B:T * B, :], w_b[H:2 * H, :],
                        preferred_element_type=jnp.float32)
              + b_b_r[...])

    w_hh_f = w_hh_f_r[...]
    h = jnp.zeros((B, H), jnp.float32)
    c = jnp.zeros((B, H), jnp.float32)
    for t in range(T):
        gates = proj_f[t * B:(t + 1) * B, :] + jnp.dot(
            h, w_hh_f, preferred_element_type=jnp.float32)
        i = jax.nn.sigmoid(gates[:, 0:H])
        f = jax.nn.sigmoid(gates[:, H:2 * H])
        g = jnp.tanh(gates[:, 2 * H:3 * H])
        o = jax.nn.sigmoid(gates[:, 3 * H:4 * H])
        c = f * c + i * g
        h = o * jnp.tanh(c)
    h_f_last = h

    # Backward first step with zero init: c0 = 0 => forget term vanishes.
    ib = jax.nn.sigmoid(gb[:, 0:H])
    gg = jnp.tanh(gb[:, 2 * H:3 * H])
    ob = jax.nn.sigmoid(gb[:, 3 * H:4 * H])
    h_b_last = ob * jnp.tanh(ib * gg)

    # ---- FC head: split fc_w by direction to avoid an in-kernel concat ----
    fc_w = fc_w_ref[...]                                           # (2H, C)
    out_ref[...] = (jnp.dot(h_f_last, fc_w[0:H, :],
                            preferred_element_type=jnp.float32)
                    + jnp.dot(h_b_last, fc_w[H:2 * H, :],
                              preferred_element_type=jnp.float32)
                    + fc_b_ref[...])


# ------------------------------- wrapper -----------------------------------

def _full_spec(shape):
    # Whole array resident in VMEM for every (single) grid step.
    return pl.BlockSpec(shape, lambda *_: (0,) * len(shape))


def text_rnn_forward(prepared, tokens, *, hidden_size, num_layers,
                     num_classes):
    """tokens: (B, T) int32 -> logits (B, num_classes)."""
    H = hidden_size
    # Embedding lookup (data-dependent gather) stays in XLA.
    emb = jnp.take(prepared["embedding"], tokens, axis=0)          # (B, T, E)
    B, T, E = emb.shape
    Bp = ((B + 7) // 8) * 8            # pad batch to the 8-sublane granule
    x = jnp.transpose(emb, (1, 0, 2)).astype(jnp.float32)          # (T, B, E)
    if Bp != B:
        x = jnp.pad(x, ((0, 0), (0, Bp - B), (0, 0)))
    x = x.reshape(T * Bp, E)           # time-major flat, sublane-aligned rows

    inputs = [x]
    in_specs = [_full_spec((T * Bp, E))]
    for l in range(num_layers - 1):
        lw = prepared["lstm"][l]
        for name in ("w_ih_f_exp", "w_ih_b_exp", "b_exp", "w_hh_blk"):
            a = lw[name]
            inputs.append(a)
            in_specs.append(_full_spec(a.shape))
    lw = prepared["lstm"][num_layers - 1]
    for name in ("w_ih_f", "w_hh_f", "b_f", "w_ih_b", "b_b"):
        a = lw[name]
        inputs.append(a)
        in_specs.append(_full_spec(a.shape))
    inputs += [prepared["fc_w"], prepared["fc_b"]]
    in_specs += [_full_spec(prepared["fc_w"].shape),
                 _full_spec(prepared["fc_b"].shape)]

    num_buf_pairs = min(2, max(num_layers - 1, 0))
    scratch = []
    if num_layers >= 2:
        scratch += [pltpu.VMEM((T * Bp, 8 * H), jnp.float32),   # proj fwd
                    pltpu.VMEM((T * Bp, 8 * H), jnp.float32)]   # proj bwd
        scratch += [pltpu.VMEM((T * Bp, H), jnp.float32)
                    for _ in range(2 * num_buf_pairs)]          # layer outputs

    kernel = functools.partial(
        _text_rnn_kernel, seq_len=T, batch=Bp, hidden=H,
        num_layers=num_layers, num_buf_pairs=num_buf_pairs)

    out = pl.pallas_call(
        kernel,
        out_shape=jax.ShapeDtypeStruct((Bp, num_classes), jnp.float32),
        grid=(1,),
        in_specs=in_specs,
        out_specs=_full_spec((Bp, num_classes)),
        scratch_shapes=scratch,
        compiler_params=pltpu.CompilerParams(
            dimension_semantics=("arbitrary",)),
    )(*inputs)
    return out[:B]


# ------------------------------ parameters ---------------------------------

def init_params(key, vocab_size, embedding_dim, hidden_size, num_layers,
                num_classes):
    """Raw parameters in PyTorch layout (w_ih: (4H, D), w_hh: (4H, H))."""
    H = hidden_size
    scale = 1.0 / jnp.sqrt(jnp.float32(H))

    def nxt():
        nonlocal key
        key, sub = jax.random.split(key)
        return sub

    emb = jax.random.normal(nxt(), (vocab_size, embedding_dim), jnp.float32)
    emb = emb.at[vocab_size - 1].set(0.0)     # padding_idx = vocab_size - 1

    lstm_layers = []
    for l in range(num_layers):
        d_in = embedding_dim if l == 0 else 2 * H
        layer = {}
        for d in ("f", "b"):
            layer[f"w_ih_{d}"] = jax.random.uniform(
                nxt(), (4 * H, d_in), jnp.float32, -scale, scale)
            layer[f"w_hh_{d}"] = jax.random.uniform(
                nxt(), (4 * H, H), jnp.float32, -scale, scale)
            layer[f"b_ih_{d}"] = jax.random.uniform(
                nxt(), (4 * H,), jnp.float32, -scale, scale)
            layer[f"b_hh_{d}"] = jax.random.uniform(
                nxt(), (4 * H,), jnp.float32, -scale, scale)
        lstm_layers.append(layer)

    fc_scale = 1.0 / jnp.sqrt(jnp.float32(2 * H))
    fc_w = jax.random.uniform(nxt(), (num_classes, 2 * H), jnp.float32,
                              -fc_scale, fc_scale)
    fc_b = jax.random.uniform(nxt(), (num_classes,), jnp.float32,
                              -fc_scale, fc_scale)
    return {"embedding": emb, "lstm": lstm_layers, "fc_w": fc_w, "fc_b": fc_b}


def _interleave_gates(w_t, hidden, direction):
    """Place a (D, 4H) matrix (PyTorch gate order i,f,g,o along columns) into
    the fused (D, 8H) layout [i_f,i_b,f_f,f_b,g_f,g_b,o_f,o_b]; the other
    direction's slots are zero."""
    D = w_t.shape[0]
    out = jnp.zeros((D, 4, 2, hidden), w_t.dtype)
    out = out.at[:, :, direction, :].set(w_t.reshape(D, 4, hidden))
    return out.reshape(D, 8 * hidden)


def prepare_params(raw, hidden_size):
    """One-off weight prep: transpose, sum biases, build fused-gate layouts."""
    H = hidden_size
    prepared = {"embedding": raw["embedding"].astype(jnp.float32)}
    L = len(raw["lstm"])
    layers = []
    for l, p in enumerate(raw["lstm"]):
        w_ih_f = jnp.transpose(p["w_ih_f"]).astype(jnp.float32)   # (D, 4H)
        w_ih_b = jnp.transpose(p["w_ih_b"]).astype(jnp.float32)
        w_hh_f = jnp.transpose(p["w_hh_f"]).astype(jnp.float32)   # (H, 4H)
        w_hh_b = jnp.transpose(p["w_hh_b"]).astype(jnp.float32)
        b_f = (p["b_ih_f"] + p["b_hh_f"]).astype(jnp.float32).reshape(1, 4 * H)
        b_b = (p["b_ih_b"] + p["b_hh_b"]).astype(jnp.float32).reshape(1, 4 * H)
        if l < L - 1:
            layers.append({
                "w_ih_f_exp": _interleave_gates(w_ih_f, H, 0),     # (D, 8H)
                "w_ih_b_exp": _interleave_gates(w_ih_b, H, 1),     # (D, 8H)
                "b_exp": (_interleave_gates(b_f, H, 0)
                          + _interleave_gates(b_b, H, 1)),          # (1, 8H)
                # block-diagonal hidden weight: rows 0:H act on h_fwd,
                # rows H:2H on h_bwd; columns in interleaved gate order.
                "w_hh_blk": jnp.concatenate(
                    [_interleave_gates(w_hh_f, H, 0),
                     _interleave_gates(w_hh_b, H, 1)], axis=0),     # (2H, 8H)
            })
        else:
            layers.append({"w_ih_f": w_ih_f, "w_hh_f": w_hh_f, "b_f": b_f,
                           "w_ih_b": w_ih_b, "b_b": b_b})
    prepared["lstm"] = layers
    prepared["fc_w"] = jnp.transpose(raw["fc_w"]).astype(jnp.float32)  # (2H,C)
    prepared["fc_b"] = raw["fc_b"].reshape(1, -1).astype(jnp.float32)  # (1,C)
    return prepared


# --------------------------- pure-JAX reference ----------------------------

def text_rnn_reference(raw, tokens, *, hidden_size, num_layers):
    H = hidden_size
    emb = jnp.take(raw["embedding"], tokens, axis=0).astype(jnp.float32)
    seq = jnp.transpose(emb, (1, 0, 2))                       # (T, B, E)
    B = seq.shape[1]

    def run_dir(x_tbd, w_ih, w_hh, b_ih, b_hh):
        def step(carry, x_t):
            h, c = carry
            gates = x_t @ w_ih.T + h @ w_hh.T + b_ih + b_hh
            i = jax.nn.sigmoid(gates[:, 0:H])
            f = jax.nn.sigmoid(gates[:, H:2 * H])
            g = jnp.tanh(gates[:, 2 * H:3 * H])
            o = jax.nn.sigmoid(gates[:, 3 * H:4 * H])
            c = f * c + i * g
            h = o * jnp.tanh(c)
            return (h, c), h
        z = jnp.zeros((B, H), jnp.float32)
        _, hs = lax.scan(step, (z, z), x_tbd)
        return hs                                             # (T, B, H)

    out = seq
    for l in range(num_layers):
        p = raw["lstm"][l]
        hf = run_dir(out, p["w_ih_f"], p["w_hh_f"], p["b_ih_f"], p["b_hh_f"])
        hb = run_dir(out[::-1], p["w_ih_b"], p["w_hh_b"],
                     p["b_ih_b"], p["b_hh_b"])[::-1]
        out = jnp.concatenate([hf, hb], axis=-1)              # (T, B, 2H)
    last = out[-1]                                            # (B, 2H)
    return last @ raw["fc_w"].T + raw["fc_b"]


# --------------------------------- main -------------------------------------

if __name__ == "__main__":
    vocab_size = 50
    embedding_dim = 32
    hidden_size = 32
    num_layers = 2
    num_classes = 5
    batch = 2
    seq_len = 8

    key = jax.random.PRNGKey(0)
    pkey, tkey = jax.random.split(key)
    raw = init_params(pkey, vocab_size, embedding_dim, hidden_size,
                      num_layers, num_classes)
    prepared = prepare_params(raw, hidden_size)
    tokens = jax.random.randint(tkey, (batch, seq_len), 0, vocab_size,
                                dtype=jnp.int32)

    fwd = jax.jit(functools.partial(text_rnn_forward,
                                    hidden_size=hidden_size,
                                    num_layers=num_layers,
                                    num_classes=num_classes))
    logits = fwd(prepared, tokens)
    jax.block_until_ready(logits)

    assert logits.shape == (batch, num_classes)
    assert bool(jnp.all(jnp.isfinite(logits)))

    # Sanity check vs a pure-JAX reference.  Tolerance is loose because the
    # in-kernel MXU matmuls and XLA's reference matmuls may use different
    # default-precision f32 strategies.
    ref = text_rnn_reference(raw, tokens, hidden_size=hidden_size,
                             num_layers=num_layers)
    max_err = float(jnp.max(jnp.abs(logits - ref)))
    assert max_err < 5e-2, f"mismatch vs reference: {max_err}"

    print("KERNEL_OK")
</pallas_src>

<mosaic_0001>
module attributes {stable_mosaic.version = 11 : i64} {
  func.func @_text_rnn_kernel(%arg0: i32, %arg1: memref<64x32xf32, #tpu.memory_space<vmem>>, %arg2: memref<32x256xf32, #tpu.memory_space<vmem>>, %arg3: memref<32x256xf32, #tpu.memory_space<vmem>>, %arg4: memref<1x256xf32, #tpu.memory_space<vmem>>, %arg5: memref<64x256xf32, #tpu.memory_space<vmem>>, %arg6: memref<64x128xf32, #tpu.memory_space<vmem>>, %arg7: memref<32x128xf32, #tpu.memory_space<vmem>>, %arg8: memref<1x128xf32, #tpu.memory_space<vmem>>, %arg9: memref<64x128xf32, #tpu.memory_space<vmem>>, %arg10: memref<1x128xf32, #tpu.memory_space<vmem>>, %arg11: memref<64x5xf32, #tpu.memory_space<vmem>>, %arg12: memref<1x5xf32, #tpu.memory_space<vmem>>, %arg13: memref<8x5xf32, #tpu.memory_space<vmem>>, %arg14: memref<64x256xf32, #tpu.memory_space<vmem>>, %arg15: memref<64x256xf32, #tpu.memory_space<vmem>>, %arg16: memref<64x32xf32, #tpu.memory_space<vmem>>, %arg17: memref<64x32xf32, #tpu.memory_space<vmem>>) attributes {dimension_semantics = [#tpu.dimension_semantics<arbitrary>], iteration_bounds = array<i64: 1>, scalar_prefetch = 0 : i64, scratch_operands = 4 : i64, tpu.core_type = #tpu.core_type<tc>, window_params = [{pipeline_mode = #tpu.pipeline_mode<synchronous>, transform_indices = @transform_0, window_bounds = array<i64: 64, 32>}, {pipeline_mode = #tpu.pipeline_mode<synchronous>, transform_indices = @transform_1, window_bounds = array<i64: 32, 256>}, {pipeline_mode = #tpu.pipeline_mode<synchronous>, transform_indices = @transform_2, window_bounds = array<i64: 32, 256>}, {pipeline_mode = #tpu.pipeline_mode<synchronous>, transform_indices = @transform_3, window_bounds = array<i64: 1, 256>}, {pipeline_mode = #tpu.pipeline_mode<synchronous>, transform_indices = @transform_4, window_bounds = array<i64: 64, 256>}, {pipeline_mode = #tpu.pipeline_mode<synchronous>, transform_indices = @transform_5, window_bounds = array<i64: 64, 128>}, {pipeline_mode = #tpu.pipeline_mode<synchronous>, transform_indices = @transform_6, window_bounds = array<i64: 32, 128>}, {pipeline_mode = #tpu.pipeline_mode<synchronous>, transform_indices = @transform_7, window_bounds = array<i64: 1, 128>}, {pipeline_mode = #tpu.pipeline_mode<synchronous>, transform_indices = @transform_8, window_bounds = array<i64: 64, 128>}, {pipeline_mode = #tpu.pipeline_mode<synchronous>, transform_indices = @transform_9, window_bounds = array<i64: 1, 128>}, {pipeline_mode = #tpu.pipeline_mode<synchronous>, transform_indices = @transform_10, window_bounds = array<i64: 64, 5>}, {pipeline_mode = #tpu.pipeline_mode<synchronous>, transform_indices = @transform_11, window_bounds = array<i64: 1, 5>}, {pipeline_mode = #tpu.pipeline_mode<synchronous>, transform_indices = @transform_12, window_bounds = array<i64: 8, 5>}]} {
    %c0 = arith.constant 0 : index
    %c0_0 = arith.constant 0 : index
    %0 = vector.load %arg1[%c0, %c0_0] : memref<64x32xf32, #tpu.memory_space<vmem>>, vector<64x32xf32>
    %c0_1 = arith.constant 0 : index
    %c0_2 = arith.constant 0 : index
    %1 = vector.load %arg2[%c0_1, %c0_2] : memref<32x256xf32, #tpu.memory_space<vmem>>, vector<32x256xf32>
    %cst = arith.constant dense<0.000000e+00> : vector<64x256xf32>
    %2 = tpu.matmul %0, %1, %cst {dimension_numbers = #tpu.dot_dimension_numbers<[1], [0], [0], [1], [0, 0, 1, 1], [], []>} : vector<64x32xf32>, vector<32x256xf32>, vector<64x256xf32> -> vector<64x256xf32>
    %c0_3 = arith.constant 0 : index
    %c0_4 = arith.constant 0 : index
    %3 = vector.load %arg4[%c0_3, %c0_4] : memref<1x256xf32, #tpu.memory_space<vmem>>, vector<1x256xf32>
    %4 = vector.broadcast %3 : vector<1x256xf32> to vector<64x256xf32>
    %5 = arith.addf %2, %4 : vector<64x256xf32>
    %c0_5 = arith.constant 0 : index
    %c0_6 = arith.constant 0 : index
    %6 = vector.load %arg14[%c0_5, %c0_6] : memref<64x256xf32, #tpu.memory_space<vmem>>, vector<64x256xf32>
    tpu.vector_store %arg14[%c0_5, %c0_6], %5 {strides = array<i32>} : memref<64x256xf32, #tpu.memory_space<vmem>>, vector<64x256xf32>,
    %c0_7 = arith.constant 0 : index
    %c0_8 = arith.constant 0 : index
    %7 = vector.load %arg3[%c0_7, %c0_8] : memref<32x256xf32, #tpu.memory_space<vmem>>, vector<32x256xf32>
    %cst_9 = arith.constant dense<0.000000e+00> : vector<64x256xf32>
    %8 = tpu.matmul %0, %7, %cst_9 {dimension_numbers = #tpu.dot_dimension_numbers<[1], [0], [0], [1], [0, 0, 1, 1], [], []>} : vector<64x32xf32>, vector<32x256xf32>, vector<64x256xf32> -> vector<64x256xf32>
    %c0_10 = arith.constant 0 : index
    %c0_11 = arith.constant 0 : index
    %9 = vector.load %arg15[%c0_10, %c0_11] : memref<64x256xf32, #tpu.memory_space<vmem>>, vector<64x256xf32>
    tpu.vector_store %arg15[%c0_10, %c0_11], %8 {strides = array<i32>} : memref<64x256xf32, #tpu.memory_space<vmem>>, vector<64x256xf32>,
    %c0_12 = arith.constant 0 : index
    %c0_13 = arith.constant 0 : index
    %10 = vector.load %arg5[%c0_12, %c0_13] : memref<64x256xf32, #tpu.memory_space<vmem>>, vector<64x256xf32>
    %cst_14 = arith.constant 0.000000e+00 : f32
    %11 = vector.broadcast %cst_14 : f32 to vector<8x64xf32>
    %cst_15 = arith.constant 0.000000e+00 : f32
    %12 = vector.broadcast %cst_15 : f32 to vector<8x64xf32>
    %c0_16 = arith.constant 0 : index
    %c0_17 = arith.constant 0 : index
    %13 = vector.load %arg14[%c0_16, %c0_17] : memref<64x256xf32, #tpu.memory_space<vmem>>, vector<8x256xf32>
    %c56 = arith.constant 56 : index
    %c0_18 = arith.constant 0 : index
    %14 = vector.load %arg15[%c56, %c0_18] : memref<64x256xf32, #tpu.memory_space<vmem>>, vector<8x256xf32>
    %15 = arith.addf %13, %14 : vector<8x256xf32>
    %cst_19 = arith.constant dense<0.000000e+00> : vector<8x256xf32>
    %16 = tpu.matmul %11, %10, %cst_19 {dimension_numbers = #tpu.dot_dimension_numbers<[1], [0], [0], [1], [0, 0, 1, 1], [], []>} : vector<8x64xf32>, vector<64x256xf32>, vector<8x256xf32> -> vector<8x256xf32>
    %17 = arith.addf %15, %16 : vector<8x256xf32>
    %18 = vector.extract_strided_slice %17 {offsets = [0, 0], sizes = [8, 64], strides = [1, 1]} : vector<8x256xf32> to vector<8x64xf32>
    %19 = arith.negf %18 : vector<8x64xf32>
    %20 = math.exp %19 : vector<8x64xf32>
    %cst_20 = arith.constant 1.000000e+00 : f32
    %21 = vector.broadcast %cst_20 : f32 to vector<8x64xf32>
    %22 = arith.addf %21, %20 : vector<8x64xf32>
    %23 = arith.divf %21, %22 : vector<8x64xf32>
    %24 = vector.extract_strided_slice %17 {offsets = [0, 64], sizes = [8, 64], strides = [1, 1]} : vector<8x256xf32> to vector<8x64xf32>
    %25 = arith.negf %24 : vector<8x64xf32>
    %26 = math.exp %25 : vector<8x64xf32>
    %cst_21 = arith.constant 1.000000e+00 : f32
    %27 = vector.broadcast %cst_21 : f32 to vector<8x64xf32>
    %28 = arith.addf %27, %26 : vector<8x64xf32>
    %29 = arith.divf %27, %28 : vector<8x64xf32>
    %30 = vector.extract_strided_slice %17 {offsets = [0, 128], sizes = [8, 64], strides = [1, 1]} : vector<8x256xf32> to vector<8x64xf32>
    %31 = math.tanh %30 : vector<8x64xf32>
    %32 = vector.extract_strided_slice %17 {offsets = [0, 192], sizes = [8, 64], strides = [1, 1]} : vector<8x256xf32> to vector<8x64xf32>
    %33 = arith.negf %32 : vector<8x64xf32>
    %34 = math.exp %33 : vector<8x64xf32>
    %cst_22 = arith.constant 1.000000e+00 : f32
    %35 = vector.broadcast %cst_22 : f32 to vector<8x64xf32>
    %36 = arith.addf %35, %34 : vector<8x64xf32>
    %37 = arith.divf %35, %36 : vector<8x64xf32>
    %38 = arith.mulf %29, %12 : vector<8x64xf32>
    %39 = arith.mulf %23, %31 : vector<8x64xf32>
    %40 = arith.addf %38, %39 : vector<8x64xf32>
    %41 = math.tanh %40 : vector<8x64xf32>
    %42 = arith.mulf %37, %41 : vector<8x64xf32>
    %43 = vector.extract_strided_slice %42 {offsets = [0, 0], sizes = [8, 32], strides = [1, 1]} : vector<8x64xf32> to vector<8x32xf32>
    %c0_23 = arith.constant 0 : index
    %c0_24 = arith.constant 0 : index
    %44 = vector.load %arg16[%c0_23, %c0_24] : memref<64x32xf32, #tpu.memory_space<vmem>>, vector<8x32xf32>
    tpu.vector_store %arg16[%c0_23, %c0_24], %43 {strides = array<i32>} : memref<64x32xf32, #tpu.memory_space<vmem>>, vector<8x32xf32>,
    %45 = vector.extract_strided_slice %42 {offsets = [0, 32], sizes = [8, 32], strides = [1, 1]} : vector<8x64xf32> to vector<8x32xf32>
    %c56_25 = arith.constant 56 : index
    %c0_26 = arith.constant 0 : index
    %46 = vector.load %arg17[%c56_25, %c0_26] : memref<64x32xf32, #tpu.memory_space<vmem>>, vector<8x32xf32>
    tpu.vector_store %arg17[%c56_25, %c0_26], %45 {strides = array<i32>} : memref<64x32xf32, #tpu.memory_space<vmem>>, vector<8x32xf32>,
    %c8 = arith.constant 8 : index
    %c0_27 = arith.constant 0 : index
    %47 = vector.load %arg14[%c8, %c0_27] : memref<64x256xf32, #tpu.memory_space<vmem>>, vector<8x256xf32>
    %c48 = arith.constant 48 : index
    %c0_28 = arith.constant 0 : index
    %48 = vector.load %arg15[%c48, %c0_28] : memref<64x256xf32, #tpu.memory_space<vmem>>, vector<8x256xf32>
    %49 = arith.addf %47, %48 : vector<8x256xf32>
    %cst_29 = arith.constant dense<0.000000e+00> : vector<8x256xf32>
    %50 = tpu.matmul %42, %10, %cst_29 {dimension_numbers = #tpu.dot_dimension_numbers<[1], [0], [0], [1], [0, 0, 1, 1], [], []>} : vector<8x64xf32>, vector<64x256xf32>, vector<8x256xf32> -> vector<8x256xf32>
    %51 = arith.addf %49, %50 : vector<8x256xf32>
    %52 = vector.extract_strided_slice %51 {offsets = [0, 0], sizes = [8, 64], strides = [1, 1]} : vector<8x256xf32> to vector<8x64xf32>
    %53 = arith.negf %52 : vector<8x64xf32>
    %54 = math.exp %53 : vector<8x64xf32>
    %cst_30 = arith.constant 1.000000e+00 : f32
    %55 = vector.broadcast %cst_30 : f32 to vector<8x64xf32>
    %56 = arith.addf %55, %54 : vector<8x64xf32>
    %57 = arith.divf %55, %56 : vector<8x64xf32>
    %58 = vector.extract_strided_slice %51 {offsets = [0, 64], sizes = [8, 64], strides = [1, 1]} : vector<8x256xf32> to vector<8x64xf32>
    %59 = arith.negf %58 : vector<8x64xf32>
    %60 = math.exp %59 : vector<8x64xf32>
    %cst_31 = arith.constant 1.000000e+00 : f32
    %61 = vector.broadcast %cst_31 : f32 to vector<8x64xf32>
    %62 = arith.addf %61, %60 : vector<8x64xf32>
    %63 = arith.divf %61, %62 : vector<8x64xf32>
    %64 = vector.extract_strided_slice %51 {offsets = [0, 128], sizes = [8, 64], strides = [1, 1]} : vector<8x256xf32> to vector<8x64xf32>
    %65 = math.tanh %64 : vector<8x64xf32>
    %66 = vector.extract_strided_slice %51 {offsets = [0, 192], sizes = [8, 64], strides = [1, 1]} : vector<8x256xf32> to vector<8x64xf32>
    %67 = arith.negf %66 : vector<8x64xf32>
    %68 = math.exp %67 : vector<8x64xf32>
    %cst_32 = arith.constant 1.000000e+00 : f32
    %69 = vector.broadcast %cst_32 : f32 to vector<8x64xf32>
    %70 = arith.addf %69, %68 : vector<8x64xf32>
    %71 = arith.divf %69, %70 : vector<8x64xf32>
    %72 = arith.mulf %63, %40 : vector<8x64xf32>
    %73 = arith.mulf %57, %65 : vector<8x64xf32>
    %74 = arith.addf %72, %73 : vector<8x64xf32>
    %75 = math.tanh %74 : vector<8x64xf32>
    %76 = arith.mulf %71, %75 : vector<8x64xf32>
    %77 = vector.extract_strided_slice %76 {offsets = [0, 0], sizes = [8, 32], strides = [1, 1]} : vector<8x64xf32> to vector<8x32xf32>
    %c8_33 = arith.constant 8 : index
    %c0_34 = arith.constant 0 : index
    %78 = vector.load %arg16[%c8_33, %c0_34] : memref<64x32xf32, #tpu.memory_space<vmem>>, vector<8x32xf32>
    tpu.vector_store %arg16[%c8_33, %c0_34], %77 {strides = array<i32>} : memref<64x32xf32, #tpu.memory_space<vmem>>, vector<8x32xf32>,
    %79 = vector.extract_strided_slice %76 {offsets = [0, 32], sizes = [8, 32], strides = [1, 1]} : vector<8x64xf32> to vector<8x32xf32>
    %c48_35 = arith.constant 48 : index
    %c0_36 = arith.constant 0 : index
    %80 = vector.load %arg17[%c48_35, %c0_36] : memref<64x32xf32, #tpu.memory_space<vmem>>, vector<8x32xf32>
    tpu.vector_store %arg17[%c48_35, %c0_36], %79 {strides = array<i32>} : memref<64x32xf32, #tpu.memory_space<vmem>>, vector<8x32xf32>,
    %c16 = arith.constant 16 : index
    %c0_37 = arith.constant 0 : index
    %81 = vector.load %arg14[%c16, %c0_37] : memref<64x256xf32, #tpu.memory_space<vmem>>, vector<8x256xf32>
    %c40 = arith.constant 40 : index
    %c0_38 = arith.constant 0 : index
    %82 = vector.load %arg15[%c40, %c0_38] : memref<64x256xf32, #tpu.memory_space<vmem>>, vector<8x256xf32>
    %83 = arith.addf %81, %82 : vector<8x256xf32>
    %cst_39 = arith.constant dense<0.000000e+00> : vector<8x256xf32>
    %84 = tpu.matmul %76, %10, %cst_39 {dimension_numbers = #tpu.dot_dimension_numbers<[1], [0], [0], [1], [0, 0, 1, 1], [], []>} : vector<8x64xf32>, vector<64x256xf32>, vector<8x256xf32> -> vector<8x256xf32>
    %85 = arith.addf %83, %84 : vector<8x256xf32>
    %86 = vector.extract_strided_slice %85 {offsets = [0, 0], sizes = [8, 64], strides = [1, 1]} : vector<8x256xf32> to vector<8x64xf32>
    %87 = arith.negf %86 : vector<8x64xf32>
    %88 = math.exp %87 : vector<8x64xf32>
    %cst_40 = arith.constant 1.000000e+00 : f32
    %89 = vector.broadcast %cst_40 : f32 to vector<8x64xf32>
    %90 = arith.addf %89, %88 : vector<8x64xf32>
    %91 = arith.divf %89, %90 : vector<8x64xf32>
    %92 = vector.extract_strided_slice %85 {offsets = [0, 64], sizes = [8, 64], strides = [1, 1]} : vector<8x256xf32> to vector<8x64xf32>
    %93 = arith.negf %92 : vector<8x64xf32>
    %94 = math.exp %93 : vector<8x64xf32>
    %cst_41 = arith.constant 1.000000e+00 : f32
    %95 = vector.broadcast %cst_41 : f32 to vector<8x64xf32>
    %96 = arith.addf %95, %94 : vector<8x64xf32>
    %97 = arith.divf %95, %96 : vector<8x64xf32>
    %98 = vector.extract_strided_slice %85 {offsets = [0, 128], sizes = [8, 64], strides = [1, 1]} : vector<8x256xf32> to vector<8x64xf32>
    %99 = math.tanh %98 : vector<8x64xf32>
    %100 = vector.extract_strided_slice %85 {offsets = [0, 192], sizes = [8, 64], strides = [1, 1]} : vector<8x256xf32> to vector<8x64xf32>
    %101 = arith.negf %100 : vector<8x64xf32>
    %102 = math.exp %101 : vector<8x64xf32>
    %cst_42 = arith.constant 1.000000e+00 : f32
    %103 = vector.broadcast %cst_42 : f32 to vector<8x64xf32>
    %104 = arith.addf %103, %102 : vector<8x64xf32>
    %105 = arith.divf %103, %104 : vector<8x64xf32>
    %106 = arith.mulf %97, %74 : vector<8x64xf32>
    %107 = arith.mulf %91, %99 : vector<8x64xf32>
    %108 = arith.addf %106, %107 : vector<8x64xf32>
    %109 = math.tanh %108 : vector<8x64xf32>
    %110 = arith.mulf %105, %109 : vector<8x64xf32>
    %111 = vector.extract_strided_slice %110 {offsets = [0, 0], sizes = [8, 32], strides = [1, 1]} : vector<8x64xf32> to vector<8x32xf32>
    %c16_43 = arith.constant 16 : index
    %c0_44 = arith.constant 0 : index
    %112 = vector.load %arg16[%c16_43, %c0_44] : memref<64x32xf32, #tpu.memory_space<vmem>>, vector<8x32xf32>
    tpu.vector_store %arg16[%c16_43, %c0_44], %111 {strides = array<i32>} : memref<64x32xf32, #tpu.memory_space<vmem>>, vector<8x32xf32>,
    %113 = vector.extract_strided_slice %110 {offsets = [0, 32], sizes = [8, 32], strides = [1, 1]} : vector<8x64xf32> to vector<8x32xf32>
    %c40_45 = arith.constant 40 : index
    %c0_46 = arith.constant 0 : index
    %114 = vector.load %arg17[%c40_45, %c0_46] : memref<64x32xf32, #tpu.memory_space<vmem>>, vector<8x32xf32>
    tpu.vector_store %arg17[%c40_45, %c0_46], %113 {strides = array<i32>} : memref<64x32xf32, #tpu.memory_space<vmem>>, vector<8x32xf32>,
    %c24 = arith.constant 24 : index
    %c0_47 = arith.constant 0 : index
    %115 = vector.load %arg14[%c24, %c0_47] : memref<64x256xf32, #tpu.memory_space<vmem>>, vector<8x256xf32>
    %c32 = arith.constant 32 : index
    %c0_48 = arith.constant 0 : index
    %116 = vector.load %arg15[%c32, %c0_48] : memref<64x256xf32, #tpu.memory_space<vmem>>, vector<8x256xf32>
    %117 = arith.addf %115, %116 : vector<8x256xf32>
    %cst_49 = arith.constant dense<0.000000e+00> : vector<8x256xf32>
    %118 = tpu.matmul %110, %10, %cst_49 {dimension_numbers = #tpu.dot_dimension_numbers<[1], [0], [0], [1], [0, 0, 1, 1], [], []>} : vector<8x64xf32>, vector<64x256xf32>, vector<8x256xf32> -> vector<8x256xf32>
    %119 = arith.addf %117, %118 : vector<8x256xf32>
    %120 = vector.extract_strided_slice %119 {offsets = [0, 0], sizes = [8, 64], strides = [1, 1]} : vector<8x256xf32> to vector<8x64xf32>
    %121 = arith.negf %120 : vector<8x64xf32>
    %122 = math.exp %121 : vector<8x64xf32>
    %cst_50 = arith.constant 1.000000e+00 : f32
    %123 = vector.broadcast %cst_50 : f32 to vector<8x64xf32>
    %124 = arith.addf %123, %122 : vector<8x64xf32>
    %125 = arith.divf %123, %124 : vector<8x64xf32>
    %126 = vector.extract_strided_slice %119 {offsets = [0, 64], sizes = [8, 64], strides = [1, 1]} : vector<8x256xf32> to vector<8x64xf32>
    %127 = arith.negf %126 : vector<8x64xf32>
    %128 = math.exp %127 : vector<8x64xf32>
    %cst_51 = arith.constant 1.000000e+00 : f32
    %129 = vector.broadcast %cst_51 : f32 to vector<8x64xf32>
    %130 = arith.addf %129, %128 : vector<8x64xf32>
    %131 = arith.divf %129, %130 : vector<8x64xf32>
    %132 = vector.extract_strided_slice %119 {offsets = [0, 128], sizes = [8, 64], strides = [1, 1]} : vector<8x256xf32> to vector<8x64xf32>
    %133 = math.tanh %132 : vector<8x64xf32>
    %134 = vector.extract_strided_slice %119 {offsets = [0, 192], sizes = [8, 64], strides = [1, 1]} : vector<8x256xf32> to vector<8x64xf32>
    %135 = arith.negf %134 : vector<8x64xf32>
    %136 = math.exp %135 : vector<8x64xf32>
    %cst_52 = arith.constant 1.000000e+00 : f32
    %137 = vector.broadcast %cst_52 : f32 to vector<8x64xf32>
    %138 = arith.addf %137, %136 : vector<8x64xf32>
    %139 = arith.divf %137, %138 : vector<8x64xf32>
    %140 = arith.mulf %131, %108 : vector<8x64xf32>
    %141 = arith.mulf %125, %133 : vector<8x64xf32>
    %142 = arith.addf %140, %141 : vector<8x64xf32>
    %143 = math.tanh %142 : vector<8x64xf32>
    %144 = arith.mulf %139, %143 : vector<8x64xf32>
    %145 = vector.extract_strided_slice %144 {offsets = [0, 0], sizes = [8, 32], strides = [1, 1]} : vector<8x64xf32> to vector<8x32xf32>
    %c24_53 = arith.constant 24 : index
    %c0_54 = arith.constant 0 : index
    %146 = vector.load %arg16[%c24_53, %c0_54] : memref<64x32xf32, #tpu.memory_space<vmem>>, vector<8x32xf32>
    tpu.vector_store %arg16[%c24_53, %c0_54], %145 {strides = array<i32>} : memref<64x32xf32, #tpu.memory_space<vmem>>, vector<8x32xf32>,
    %147 = vector.extract_strided_slice %144 {offsets = [0, 32], sizes = [8, 32], strides = [1, 1]} : vector<8x64xf32> to vector<8x32xf32>
    %c32_55 = arith.constant 32 : index
    %c0_56 = arith.constant 0 : index
    %148 = vector.load %arg17[%c32_55, %c0_56] : memref<64x32xf32, #tpu.memory_space<vmem>>, vector<8x32xf32>
    tpu.vector_store %arg17[%c32_55, %c0_56], %147 {strides = array<i32>} : memref<64x32xf32, #tpu.memory_space<vmem>>, vector<8x32xf32>,
    %c32_57 = arith.constant 32 : index
    %c0_58 = arith.constant 0 : index
    %149 = vector.load %arg14[%c32_57, %c0_58] : memref<64x256xf32, #tpu.memory_space<vmem>>, vector<8x256xf32>
    %c24_59 = arith.constant 24 : index
    %c0_60 = arith.constant 0 : index
    %150 = vector.load %arg15[%c24_59, %c0_60] : memref<64x256xf32, #tpu.memory_space<vmem>>, vector<8x256xf32>
    %151 = arith.addf %149, %150 : vector<8x256xf32>
    %cst_61 = arith.constant dense<0.000000e+00> : vector<8x256xf32>
    %152 = tpu.matmul %144, %10, %cst_61 {dimension_numbers = #tpu.dot_dimension_numbers<[1], [0], [0], [1], [0, 0, 1, 1], [], []>} : vector<8x64xf32>, vector<64x256xf32>, vector<8x256xf32> -> vector<8x256xf32>
    %153 = arith.addf %151, %152 : vector<8x256xf32>
    %154 = vector.extract_strided_slice %153 {offsets = [0, 0], sizes = [8, 64], strides = [1, 1]} : vector<8x256xf32> to vector<8x64xf32>
    %155 = arith.negf %154 : vector<8x64xf32>
    %156 = math.exp %155 : vector<8x64xf32>
    %cst_62 = arith.constant 1.000000e+00 : f32
    %157 = vector.broadcast %cst_62 : f32 to vector<8x64xf32>
    %158 = arith.addf %157, %156 : vector<8x64xf32>
    %159 = arith.divf %157, %158 : vector<8x64xf32>
    %160 = vector.extract_strided_slice %153 {offsets = [0, 64], sizes = [8, 64], strides = [1, 1]} : vector<8x256xf32> to vector<8x64xf32>
    %161 = arith.negf %160 : vector<8x64xf32>
    %162 = math.exp %161 : vector<8x64xf32>
    %cst_63 = arith.constant 1.000000e+00 : f32
    %163 = vector.broadcast %cst_63 : f32 to vector<8x64xf32>
    %164 = arith.addf %163, %162 : vector<8x64xf32>
    %165 = arith.divf %163, %164 : vector<8x64xf32>
    %166 = vector.extract_strided_slice %153 {offsets = [0, 128], sizes = [8, 64], strides = [1, 1]} : vector<8x256xf32> to vector<8x64xf32>
    %167 = math.tanh %166 : vector<8x64xf32>
    %168 = vector.extract_strided_slice %153 {offsets = [0, 192], sizes = [8, 64], strides = [1, 1]} : vector<8x256xf32> to vector<8x64xf32>
    %169 = arith.negf %168 : vector<8x64xf32>
    %170 = math.exp %169 : vector<8x64xf32>
    %cst_64 = arith.constant 1.000000e+00 : f32
    %171 = vector.broadcast %cst_64 : f32 to vector<8x64xf32>
    %172 = arith.addf %171, %170 : vector<8x64xf32>
    %173 = arith.divf %171, %172 : vector<8x64xf32>
    %174 = arith.mulf %165, %142 : vector<8x64xf32>
    %175 = arith.mulf %159, %167 : vector<8x64xf32>
    %176 = arith.addf %174, %175 : vector<8x64xf32>
    %177 = math.tanh %176 : vector<8x64xf32>
    %178 = arith.mulf %173, %177 : vector<8x64xf32>
    %179 = vector.extract_strided_slice %178 {offsets = [0, 0], sizes = [8, 32], strides = [1, 1]} : vector<8x64xf32> to vector<8x32xf32>
    %c32_65 = arith.constant 32 : index
    %c0_66 = arith.constant 0 : index
    %180 = vector.load %arg16[%c32_65, %c0_66] : memref<64x32xf32, #tpu.memory_space<vmem>>, vector<8x32xf32>
    tpu.vector_store %arg16[%c32_65, %c0_66], %179 {strides = array<i32>} : memref<64x32xf32, #tpu.memory_space<vmem>>, vector<8x32xf32>,
    %181 = vector.extract_strided_slice %178 {offsets = [0, 32], sizes = [8, 32], strides = [1, 1]} : vector<8x64xf32> to vector<8x32xf32>
    %c24_67 = arith.constant 24 : index
    %c0_68 = arith.constant 0 : index
    %182 = vector.load %arg17[%c24_67, %c0_68] : memref<64x32xf32, #tpu.memory_space<vmem>>, vector<8x32xf32>
    tpu.vector_store %arg17[%c24_67, %c0_68], %181 {strides = array<i32>} : memref<64x32xf32, #tpu.memory_space<vmem>>, vector<8x32xf32>,
    %c40_69 = arith.constant 40 : index
    %c0_70 = arith.constant 0 : index
    %183 = vector.load %arg14[%c40_69, %c0_70] : memref<64x256xf32, #tpu.memory_space<vmem>>, vector<8x256xf32>
    %c16_71 = arith.constant 16 : index
    %c0_72 = arith.constant 0 : index
    %184 = vector.load %arg15[%c16_71, %c0_72] : memref<64x256xf32, #tpu.memory_space<vmem>>, vector<8x256xf32>
    %185 = arith.addf %183, %184 : vector<8x256xf32>
    %cst_73 = arith.constant dense<0.000000e+00> : vector<8x256xf32>
    %186 = tpu.matmul %178, %10, %cst_73 {dimension_numbers = #tpu.dot_dimension_numbers<[1], [0], [0], [1], [0, 0, 1, 1], [], []>} : vector<8x64xf32>, vector<64x256xf32>, vector<8x256xf32> -> vector<8x256xf32>
    %187 = arith.addf %185, %186 : vector<8x256xf32>
    %188 = vector.extract_strided_slice %187 {offsets = [0, 0], sizes = [8, 64], strides = [1, 1]} : vector<8x256xf32> to vector<8x64xf32>
    %189 = arith.negf %188 : vector<8x64xf32>
    %190 = math.exp %189 : vector<8x64xf32>
    %cst_74 = arith.constant 1.000000e+00 : f32
    %191 = vector.broadcast %cst_74 : f32 to vector<8x64xf32>
    %192 = arith.addf %191, %190 : vector<8x64xf32>
    %193 = arith.divf %191, %192 : vector<8x64xf32>
    %194 = vector.extract_strided_slice %187 {offsets = [0, 64], sizes = [8, 64], strides = [1, 1]} : vector<8x256xf32> to vector<8x64xf32>
    %195 = arith.negf %194 : vector<8x64xf32>
    %196 = math.exp %195 : vector<8x64xf32>
    %cst_75 = arith.constant 1.000000e+00 : f32
    %197 = vector.broadcast %cst_75 : f32 to vector<8x64xf32>
    %198 = arith.addf %197, %196 : vector<8x64xf32>
    %199 = arith.divf %197, %198 : vector<8x64xf32>
    %200 = vector.extract_strided_slice %187 {offsets = [0, 128], sizes = [8, 64], strides = [1, 1]} : vector<8x256xf32> to vector<8x64xf32>
    %201 = math.tanh %200 : vector<8x64xf32>
    %202 = vector.extract_strided_slice %187 {offsets = [0, 192], sizes = [8, 64], strides = [1, 1]} : vector<8x256xf32> to vector<8x64xf32>
    %203 = arith.negf %202 : vector<8x64xf32>
    %204 = math.exp %203 : vector<8x64xf32>
    %cst_76 = arith.constant 1.000000e+00 : f32
    %205 = vector.broadcast %cst_76 : f32 to vector<8x64xf32>
    %206 = arith.addf %205, %204 : vector<8x64xf32>
    %207 = arith.divf %205, %206 : vector<8x64xf32>
    %208 = arith.mulf %199, %176 : vector<8x64xf32>
    %209 = arith.mulf %193, %201 : vector<8x64xf32>
    %210 = arith.addf %208, %209 : vector<8x64xf32>
    %211 = math.tanh %210 : vector<8x64xf32>
    %212 = arith.mulf %207, %211 : vector<8x64xf32>
    %213 = vector.extract_strided_slice %212 {offsets = [0, 0], sizes = [8, 32], strides = [1, 1]} : vector<8x64xf32> to vector<8x32xf32>
    %c40_77 = arith.constant 40 : index
    %c0_78 = arith.constant 0 : index
    %214 = vector.load %arg16[%c40_77, %c0_78] : memref<64x32xf32, #tpu.memory_space<vmem>>, vector<8x32xf32>
    tpu.vector_store %arg16[%c40_77, %c0_78], %213 {strides = array<i32>} : memref<64x32xf32, #tpu.memory_space<vmem>>, vector<8x32xf32>,
    %215 = vector.extract_strided_slice %212 {offsets = [0, 32], sizes = [8, 32], strides = [1, 1]} : vector<8x64xf32> to vector<8x32xf32>
    %c16_79 = arith.constant 16 : index
    %c0_80 = arith.constant 0 : index
    %216 = vector.load %arg17[%c16_79, %c0_80] : memref<64x32xf32, #tpu.memory_space<vmem>>, vector<8x32xf32>
    tpu.vector_store %arg17[%c16_79, %c0_80], %215 {strides = array<i32>} : memref<64x32xf32, #tpu.memory_space<vmem>>, vector<8x32xf32>,
    %c48_81 = arith.constant 48 : index
    %c0_82 = arith.constant 0 : index
    %217 = vector.load %arg14[%c48_81, %c0_82] : memref<64x256xf32, #tpu.memory_space<vmem>>, vector<8x256xf32>
    %c8_83 = arith.constant 8 : index
    %c0_84 = arith.constant 0 : index
    %218 = vector.load %arg15[%c8_83, %c0_84] : memref<64x256xf32, #tpu.memory_space<vmem>>, vector<8x256xf32>
    %219 = arith.addf %217, %218 : vector<8x256xf32>
    %cst_85 = arith.constant dense<0.000000e+00> : vector<8x256xf32>
    %220 = tpu.matmul %212, %10, %cst_85 {dimension_numbers = #tpu.dot_dimension_numbers<[1], [0], [0], [1], [0, 0, 1, 1], [], []>} : vector<8x64xf32>, vector<64x256xf32>, vector<8x256xf32> -> vector<8x256xf32>
    %221 = arith.addf %219, %220 : vector<8x256xf32>
    %222 = vector.extract_strided_slice %221 {offsets = [0, 0], sizes = [8, 64], strides = [1, 1]} : vector<8x256xf32> to vector<8x64xf32>
    %223 = arith.negf %222 : vector<8x64xf32>
    %224 = math.exp %223 : vector<8x64xf32>
    %cst_86 = arith.constant 1.000000e+00 : f32
    %225 = vector.broadcast %cst_86 : f32 to vector<8x64xf32>
    %226 = arith.addf %225, %224 : vector<8x64xf32>
    %227 = arith.divf %225, %226 : vector<8x64xf32>
    %228 = vector.extract_strided_slice %221 {offsets = [0, 64], sizes = [8, 64], strides = [1, 1]} : vector<8x256xf32> to vector<8x64xf32>
    %229 = arith.negf %228 : vector<8x64xf32>
    %230 = math.exp %229 : vector<8x64xf32>
    %cst_87 = arith.constant 1.000000e+00 : f32
    %231 = vector.broadcast %cst_87 : f32 to vector<8x64xf32>
    %232 = arith.addf %231, %230 : vector<8x64xf32>
    %233 = arith.divf %231, %232 : vector<8x64xf32>
    %234 = vector.extract_strided_slice %221 {offsets = [0, 128], sizes = [8, 64], strides = [1, 1]} : vector<8x256xf32> to vector<8x64xf32>
    %235 = math.tanh %234 : vector<8x64xf32>
    %236 = vector.extract_strided_slice %221 {offsets = [0, 192], sizes = [8, 64], strides = [1, 1]} : vector<8x256xf32> to vector<8x64xf32>
    %237 = arith.negf %236 : vector<8x64xf32>
    %238 = math.exp %237 : vector<8x64xf32>
    %cst_88 = arith.constant 1.000000e+00 : f32
    %239 = vector.broadcast %cst_88 : f32 to vector<8x64xf32>
    %240 = arith.addf %239, %238 : vector<8x64xf32>
    %241 = arith.divf %239, %240 : vector<8x64xf32>
    %242 = arith.mulf %233, %210 : vector<8x64xf32>
    %243 = arith.mulf %227, %235 : vector<8x64xf32>
    %244 = arith.addf %242, %243 : vector<8x64xf32>
    %245 = math.tanh %244 : vector<8x64xf32>
    %246 = arith.mulf %241, %245 : vector<8x64xf32>
    %247 = vector.extract_strided_slice %246 {offsets = [0, 0], sizes = [8, 32], strides = [1, 1]} : vector<8x64xf32> to vector<8x32xf32>
    %c48_89 = arith.constant 48 : index
    %c0_90 = arith.constant 0 : index
    %248 = vector.load %arg16[%c48_89, %c0_90] : memref<64x32xf32, #tpu.memory_space<vmem>>, vector<8x32xf32>
    tpu.vector_store %arg16[%c48_89, %c0_90], %247 {strides = array<i32>} : memref<64x32xf32, #tpu.memory_space<vmem>>, vector<8x32xf32>,
    %249 = vector.extract_strided_slice %246 {offsets = [0, 32], sizes = [8, 32], strides = [1, 1]} : vector<8x64xf32> to vector<8x32xf32>
    %c8_91 = arith.constant 8 : index
    %c0_92 = arith.constant 0 : index
    %250 = vector.load %arg17[%c8_91, %c0_92] : memref<64x32xf32, #tpu.memory_space<vmem>>, vector<8x32xf32>
    tpu.vector_store %arg17[%c8_91, %c0_92], %249 {strides = array<i32>} : memref<64x32xf32, #tpu.memory_space<vmem>>, vector<8x32xf32>,
    %c56_93 = arith.constant 56 : index
    %c0_94 = arith.constant 0 : index
    %251 = vector.load %arg14[%c56_93, %c0_94] : memref<64x256xf32, #tpu.memory_space<vmem>>, vector<8x256xf32>
    %c0_95 = arith.constant 0 : index
    %c0_96 = arith.constant 0 : index
    %252 = vector.load %arg15[%c0_95, %c0_96] : memref<64x256xf32, #tpu.memory_space<vmem>>, vector<8x256xf32>
    %253 = arith.addf %251, %252 : vector<8x256xf32>
    %cst_97 = arith.constant dense<0.000000e+00> : vector<8x256xf32>
    %254 = tpu.matmul %246, %10, %cst_97 {dimension_numbers = #tpu.dot_dimension_numbers<[1], [0], [0], [1], [0, 0, 1, 1], [], []>} : vector<8x64xf32>, vector<64x256xf32>, vector<8x256xf32> -> vector<8x256xf32>
    %255 = arith.addf %253, %254 : vector<8x256xf32>
    %256 = vector.extract_strided_slice %255 {offsets = [0, 0], sizes = [8, 64], strides = [1, 1]} : vector<8x256xf32> to vector<8x64xf32>
    %257 = arith.negf %256 : vector<8x64xf32>
    %258 = math.exp %257 : vector<8x64xf32>
    %cst_98 = arith.constant 1.000000e+00 : f32
    %259 = vector.broadcast %cst_98 : f32 to vector<8x64xf32>
    %260 = arith.addf %259, %258 : vector<8x64xf32>
    %261 = arith.divf %259, %260 : vector<8x64xf32>
    %262 = vector.extract_strided_slice %255 {offsets = [0, 64], sizes = [8, 64], strides = [1, 1]} : vector<8x256xf32> to vector<8x64xf32>
    %263 = arith.negf %262 : vector<8x64xf32>
    %264 = math.exp %263 : vector<8x64xf32>
    %cst_99 = arith.constant 1.000000e+00 : f32
    %265 = vector.broadcast %cst_99 : f32 to vector<8x64xf32>
    %266 = arith.addf %265, %264 : vector<8x64xf32>
    %267 = arith.divf %265, %266 : vector<8x64xf32>
    %268 = vector.extract_strided_slice %255 {offsets = [0, 128], sizes = [8, 64], strides = [1, 1]} : vector<8x256xf32> to vector<8x64xf32>
    %269 = math.tanh %268 : vector<8x64xf32>
    %270 = vector.extract_strided_slice %255 {offsets = [0, 192], sizes = [8, 64], strides = [1, 1]} : vector<8x256xf32> to vector<8x64xf32>
    %271 = arith.negf %270 : vector<8x64xf32>
    %272 = math.exp %271 : vector<8x64xf32>
    %cst_100 = arith.constant 1.000000e+00 : f32
    %273 = vector.broadcast %cst_100 : f32 to vector<8x64xf32>
    %274 = arith.addf %273, %272 : vector<8x64xf32>
    %275 = arith.divf %273, %274 : vector<8x64xf32>
    %276 = arith.mulf %267, %244 : vector<8x64xf32>
    %277 = arith.mulf %261, %269 : vector<8x64xf32>
    %278 = arith.addf %276, %277 : vector<8x64xf32>
    %279 = math.tanh %278 : vector<8x64xf32>
    %280 = arith.mulf %275, %279 : vector<8x64xf32>
    %281 = vector.extract_strided_slice %280 {offsets = [0, 0], sizes = [8, 32], strides = [1, 1]} : vector<8x64xf32> to vector<8x32xf32>
    %c56_101 = arith.constant 56 : index
    %c0_102 = arith.constant 0 : index
    %282 = vector.load %arg16[%c56_101, %c0_102] : memref<64x32xf32, #tpu.memory_space<vmem>>, vector<8x32xf32>
    tpu.vector_store %arg16[%c56_101, %c0_102], %281 {strides = array<i32>} : memref<64x32xf32, #tpu.memory_space<vmem>>, vector<8x32xf32>,
    %283 = vector.extract_strided_slice %280 {offsets = [0, 32], sizes = [8, 32], strides = [1, 1]} : vector<8x64xf32> to vector<8x32xf32>
    %c0_103 = arith.constant 0 : index
    %c0_104 = arith.constant 0 : index
    %284 = vector.load %arg17[%c0_103, %c0_104] : memref<64x32xf32, #tpu.memory_space<vmem>>, vector<8x32xf32>
    tpu.vector_store %arg17[%c0_103, %c0_104], %283 {strides = array<i32>} : memref<64x32xf32, #tpu.memory_space<vmem>>, vector<8x32xf32>,
    %c0_105 = arith.constant 0 : index
    %c0_106 = arith.constant 0 : index
    %285 = vector.load %arg16[%c0_105, %c0_106] : memref<64x32xf32, #tpu.memory_space<vmem>>, vector<64x32xf32>
    %c0_107 = arith.constant 0 : index
    %c0_108 = arith.constant 0 : index
    %286 = vector.load %arg17[%c0_107, %c0_108] : memref<64x32xf32, #tpu.memory_space<vmem>>, vector<64x32xf32>
    %c0_109 = arith.constant 0 : index
    %c0_110 = arith.constant 0 : index
    %287 = vector.load %arg6[%c0_109, %c0_110] : memref<64x128xf32, #tpu.memory_space<vmem>>, vector<64x128xf32>
    %c0_111 = arith.constant 0 : index
    %c0_112 = arith.constant 0 : index
    %288 = vector.load %arg9[%c0_111, %c0_112] : memref<64x128xf32, #tpu.memory_space<vmem>>, vector<64x128xf32>
    %289 = vector.extract_strided_slice %287 {offsets = [0, 0], sizes = [32, 128], strides = [1, 1]} : vector<64x128xf32> to vector<32x128xf32>
    %cst_113 = arith.constant dense<0.000000e+00> : vector<64x128xf32>
    %290 = tpu.matmul %285, %289, %cst_113 {dimension_numbers = #tpu.dot_dimension_numbers<[1], [0], [0], [1], [0, 0, 1, 1], [], []>} : vector<64x32xf32>, vector<32x128xf32>, vector<64x128xf32> -> vector<64x128xf32>
    %291 = vector.extract_strided_slice %287 {offsets = [32, 0], sizes = [32, 128], strides = [1, 1]} : vector<64x128xf32> to vector<32x128xf32>
    %cst_114 = arith.constant dense<0.000000e+00> : vector<64x128xf32>
    %292 = tpu.matmul %286, %291, %cst_114 {dimension_numbers = #tpu.dot_dimension_numbers<[1], [0], [0], [1], [0, 0, 1, 1], [], []>} : vector<64x32xf32>, vector<32x128xf32>, vector<64x128xf32> -> vector<64x128xf32>
    %293 = arith.addf %290, %292 : vector<64x128xf32>
    %c0_115 = arith.constant 0 : index
    %c0_116 = arith.constant 0 : index
    %294 = vector.load %arg8[%c0_115, %c0_116] : memref<1x128xf32, #tpu.memory_space<vmem>>, vector<1x128xf32>
    %295 = vector.broadcast %294 : vector<1x128xf32> to vector<64x128xf32>
    %296 = arith.addf %293, %295 : vector<64x128xf32>
    %297 = vector.extract_strided_slice %285 {offsets = [56, 0], sizes = [8, 32], strides = [1, 1]} : vector<64x32xf32> to vector<8x32xf32>
    %298 = vector.extract_strided_slice %288 {offsets = [0, 0], sizes = [32, 128], strides = [1, 1]} : vector<64x128xf32> to vector<32x128xf32>
    %cst_117 = arith.constant dense<0.000000e+00> : vector<8x128xf32>
    %299 = tpu.matmul %297, %298, %cst_117 {dimension_numbers = #tpu.dot_dimension_numbers<[1], [0], [0], [1], [0, 0, 1, 1], [], []>} : vector<8x32xf32>, vector<32x128xf32>, vector<8x128xf32> -> vector<8x128xf32>
    %300 = vector.extract_strided_slice %286 {offsets = [56, 0], sizes = [8, 32], strides = [1, 1]} : vector<64x32xf32> to vector<8x32xf32>
    %301 = vector.extract_strided_slice %288 {offsets = [32, 0], sizes = [32, 128], strides = [1, 1]} : vector<64x128xf32> to vector<32x128xf32>
    %cst_118 = arith.constant dense<0.000000e+00> : vector<8x128xf32>
    %302 = tpu.matmul %300, %301, %cst_118 {dimension_numbers = #tpu.dot_dimension_numbers<[1], [0], [0], [1], [0, 0, 1, 1], [], []>} : vector<8x32xf32>, vector<32x128xf32>, vector<8x128xf32> -> vector<8x128xf32>
    %303 = arith.addf %299, %302 : vector<8x128xf32>
    %c0_119 = arith.constant 0 : index
    %c0_120 = arith.constant 0 : index
    %304 = vector.load %arg10[%c0_119, %c0_120] : memref<1x128xf32, #tpu.memory_space<vmem>>, vector<1x128xf32>
    %305 = vector.broadcast %304 : vector<1x128xf32> to vector<8x128xf32>
    %306 = arith.addf %303, %305 : vector<8x128xf32>
    %c0_121 = arith.constant 0 : index
    %c0_122 = arith.constant 0 : index
    %307 = vector.load %arg7[%c0_121, %c0_122] : memref<32x128xf32, #tpu.memory_space<vmem>>, vector<32x128xf32>
    %cst_123 = arith.constant 0.000000e+00 : f32
    %308 = vector.broadcast %cst_123 : f32 to vector<8x32xf32>
    %cst_124 = arith.constant 0.000000e+00 : f32
    %309 = vector.broadcast %cst_124 : f32 to vector<8x32xf32>
    %310 = vector.extract_strided_slice %296 {offsets = [0, 0], sizes = [8, 128], strides = [1, 1]} : vector<64x128xf32> to vector<8x128xf32>
    %cst_125 = arith.constant dense<0.000000e+00> : vector<8x128xf32>
    %311 = tpu.matmul %308, %307, %cst_125 {dimension_numbers = #tpu.dot_dimension_numbers<[1], [0], [0], [1], [0, 0, 1, 1], [], []>} : vector<8x32xf32>, vector<32x128xf32>, vector<8x128xf32> -> vector<8x128xf32>
    %312 = arith.addf %310, %311 : vector<8x128xf32>
    %313 = vector.extract_strided_slice %312 {offsets = [0, 0], sizes = [8, 32], strides = [1, 1]} : vector<8x128xf32> to vector<8x32xf32>
    %314 = arith.negf %313 : vector<8x32xf32>
    %315 = math.exp %314 : vector<8x32xf32>
    %cst_126 = arith.constant 1.000000e+00 : f32
    %316 = vector.broadcast %cst_126 : f32 to vector<8x32xf32>
    %317 = arith.addf %316, %315 : vector<8x32xf32>
    %318 = arith.divf %316, %317 : vector<8x32xf32>
    %319 = vector.extract_strided_slice %312 {offsets = [0, 32], sizes = [8, 32], strides = [1, 1]} : vector<8x128xf32> to vector<8x32xf32>
    %320 = arith.negf %319 : vector<8x32xf32>
    %321 = math.exp %320 : vector<8x32xf32>
    %cst_127 = arith.constant 1.000000e+00 : f32
    %322 = vector.broadcast %cst_127 : f32 to vector<8x32xf32>
    %323 = arith.addf %322, %321 : vector<8x32xf32>
    %324 = arith.divf %322, %323 : vector<8x32xf32>
    %325 = vector.extract_strided_slice %312 {offsets = [0, 64], sizes = [8, 32], strides = [1, 1]} : vector<8x128xf32> to vector<8x32xf32>
    %326 = math.tanh %325 : vector<8x32xf32>
    %327 = vector.extract_strided_slice %312 {offsets = [0, 96], sizes = [8, 32], strides = [1, 1]} : vector<8x128xf32> to vector<8x32xf32>
    %328 = arith.negf %327 : vector<8x32xf32>
    %329 = math.exp %328 : vector<8x32xf32>
    %cst_128 = arith.constant 1.000000e+00 : f32
    %330 = vector.broadcast %cst_128 : f32 to vector<8x32xf32>
    %331 = arith.addf %330, %329 : vector<8x32xf32>
    %332 = arith.divf %330, %331 : vector<8x32xf32>
    %333 = arith.mulf %324, %309 : vector<8x32xf32>
    %334 = arith.mulf %318, %326 : vector<8x32xf32>
    %335 = arith.addf %333, %334 : vector<8x32xf32>
    %336 = math.tanh %335 : vector<8x32xf32>
    %337 = arith.mulf %332, %336 : vector<8x32xf32>
    %338 = vector.extract_strided_slice %296 {offsets = [8, 0], sizes = [8, 128], strides = [1, 1]} : vector<64x128xf32> to vector<8x128xf32>
    %cst_129 = arith.constant dense<0.000000e+00> : vector<8x128xf32>
    %339 = tpu.matmul %337, %307, %cst_129 {dimension_numbers = #tpu.dot_dimension_numbers<[1], [0], [0], [1], [0, 0, 1, 1], [], []>} : vector<8x32xf32>, vector<32x128xf32>, vector<8x128xf32> -> vector<8x128xf32>
    %340 = arith.addf %338, %339 : vector<8x128xf32>
    %341 = vector.extract_strided_slice %340 {offsets = [0, 0], sizes = [8, 32], strides = [1, 1]} : vector<8x128xf32> to vector<8x32xf32>
    %342 = arith.negf %341 : vector<8x32xf32>
    %343 = math.exp %342 : vector<8x32xf32>
    %cst_130 = arith.constant 1.000000e+00 : f32
    %344 = vector.broadcast %cst_130 : f32 to vector<8x32xf32>
    %345 = arith.addf %344, %343 : vector<8x32xf32>
    %346 = arith.divf %344, %345 : vector<8x32xf32>
    %347 = vector.extract_strided_slice %340 {offsets = [0, 32], sizes = [8, 32], strides = [1, 1]} : vector<8x128xf32> to vector<8x32xf32>
    %348 = arith.negf %347 : vector<8x32xf32>
    %349 = math.exp %348 : vector<8x32xf32>
    %cst_131 = arith.constant 1.000000e+00 : f32
    %350 = vector.broadcast %cst_131 : f32 to vector<8x32xf32>
    %351 = arith.addf %350, %349 : vector<8x32xf32>
    %352 = arith.divf %350, %351 : vector<8x32xf32>
    %353 = vector.extract_strided_slice %340 {offsets = [0, 64], sizes = [8, 32], strides = [1, 1]} : vector<8x128xf32> to vector<8x32xf32>
    %354 = math.tanh %353 : vector<8x32xf32>
    %355 = vector.extract_strided_slice %340 {offsets = [0, 96], sizes = [8, 32], strides = [1, 1]} : vector<8x128xf32> to vector<8x32xf32>
    %356 = arith.negf %355 : vector<8x32xf32>
    %357 = math.exp %356 : vector<8x32xf32>
    %cst_132 = arith.constant 1.000000e+00 : f32
    %358 = vector.broadcast %cst_132 : f32 to vector<8x32xf32>
    %359 = arith.addf %358, %357 : vector<8x32xf32>
    %360 = arith.divf %358, %359 : vector<8x32xf32>
    %361 = arith.mulf %352, %335 : vector<8x32xf32>
    %362 = arith.mulf %346, %354 : vector<8x32xf32>
    %363 = arith.addf %361, %362 : vector<8x32xf32>
    %364 = math.tanh %363 : vector<8x32xf32>
    %365 = arith.mulf %360, %364 : vector<8x32xf32>
    %366 = vector.extract_strided_slice %296 {offsets = [16, 0], sizes = [8, 128], strides = [1, 1]} : vector<64x128xf32> to vector<8x128xf32>
    %cst_133 = arith.constant dense<0.000000e+00> : vector<8x128xf32>
    %367 = tpu.matmul %365, %307, %cst_133 {dimension_numbers = #tpu.dot_dimension_numbers<[1], [0], [0], [1], [0, 0, 1, 1], [], []>} : vector<8x32xf32>, vector<32x128xf32>, vector<8x128xf32> -> vector<8x128xf32>
    %368 = arith.addf %366, %367 : vector<8x128xf32>
    %369 = vector.extract_strided_slice %368 {offsets = [0, 0], sizes = [8, 32], strides = [1, 1]} : vector<8x128xf32> to vector<8x32xf32>
    %370 = arith.negf %369 : vector<8x32xf32>
    %371 = math.exp %370 : vector<8x32xf32>
    %cst_134 = arith.constant 1.000000e+00 : f32
    %372 = vector.broadcast %cst_134 : f32 to vector<8x32xf32>
    %373 = arith.addf %372, %371 : vector<8x32xf32>
    %374 = arith.divf %372, %373 : vector<8x32xf32>
    %375 = vector.extract_strided_slice %368 {offsets = [0, 32], sizes = [8, 32], strides = [1, 1]} : vector<8x128xf32> to vector<8x32xf32>
    %376 = arith.negf %375 : vector<8x32xf32>
    %377 = math.exp %376 : vector<8x32xf32>
    %cst_135 = arith.constant 1.000000e+00 : f32
    %378 = vector.broadcast %cst_135 : f32 to vector<8x32xf32>
    %379 = arith.addf %378, %377 : vector<8x32xf32>
    %380 = arith.divf %378, %379 : vector<8x32xf32>
    %381 = vector.extract_strided_slice %368 {offsets = [0, 64], sizes = [8, 32], strides = [1, 1]} : vector<8x128xf32> to vector<8x32xf32>
    %382 = math.tanh %381 : vector<8x32xf32>
    %383 = vector.extract_strided_slice %368 {offsets = [0, 96], sizes = [8, 32], strides = [1, 1]} : vector<8x128xf32> to vector<8x32xf32>
    %384 = arith.negf %383 : vector<8x32xf32>
    %385 = math.exp %384 : vector<8x32xf32>
    %cst_136 = arith.constant 1.000000e+00 : f32
    %386 = vector.broadcast %cst_136 : f32 to vector<8x32xf32>
    %387 = arith.addf %386, %385 : vector<8x32xf32>
    %388 = arith.divf %386, %387 : vector<8x32xf32>
    %389 = arith.mulf %380, %363 : vector<8x32xf32>
    %390 = arith.mulf %374, %382 : vector<8x32xf32>
    %391 = arith.addf %389, %390 : vector<8x32xf32>
    %392 = math.tanh %391 : vector<8x32xf32>
    %393 = arith.mulf %388, %392 : vector<8x32xf32>
    %394 = vector.extract_strided_slice %296 {offsets = [24, 0], sizes = [8, 128], strides = [1, 1]} : vector<64x128xf32> to vector<8x128xf32>
    %cst_137 = arith.constant dense<0.000000e+00> : vector<8x128xf32>
    %395 = tpu.matmul %393, %307, %cst_137 {dimension_numbers = #tpu.dot_dimension_numbers<[1], [0], [0], [1], [0, 0, 1, 1], [], []>} : vector<8x32xf32>, vector<32x128xf32>, vector<8x128xf32> -> vector<8x128xf32>
    %396 = arith.addf %394, %395 : vector<8x128xf32>
    %397 = vector.extract_strided_slice %396 {offsets = [0, 0], sizes = [8, 32], strides = [1, 1]} : vector<8x128xf32> to vector<8x32xf32>
    %398 = arith.negf %397 : vector<8x32xf32>
    %399 = math.exp %398 : vector<8x32xf32>
    %cst_138 = arith.constant 1.000000e+00 : f32
    %400 = vector.broadcast %cst_138 : f32 to vector<8x32xf32>
    %401 = arith.addf %400, %399 : vector<8x32xf32>
    %402 = arith.divf %400, %401 : vector<8x32xf32>
    %403 = vector.extract_strided_slice %396 {offsets = [0, 32], sizes = [8, 32], strides = [1, 1]} : vector<8x128xf32> to vector<8x32xf32>
    %404 = arith.negf %403 : vector<8x32xf32>
    %405 = math.exp %404 : vector<8x32xf32>
    %cst_139 = arith.constant 1.000000e+00 : f32
    %406 = vector.broadcast %cst_139 : f32 to vector<8x32xf32>
    %407 = arith.addf %406, %405 : vector<8x32xf32>
    %408 = arith.divf %406, %407 : vector<8x32xf32>
    %409 = vector.extract_strided_slice %396 {offsets = [0, 64], sizes = [8, 32], strides = [1, 1]} : vector<8x128xf32> to vector<8x32xf32>
    %410 = math.tanh %409 : vector<8x32xf32>
    %411 = vector.extract_strided_slice %396 {offsets = [0, 96], sizes = [8, 32], strides = [1, 1]} : vector<8x128xf32> to vector<8x32xf32>
    %412 = arith.negf %411 : vector<8x32xf32>
    %413 = math.exp %412 : vector<8x32xf32>
    %cst_140 = arith.constant 1.000000e+00 : f32
    %414 = vector.broadcast %cst_140 : f32 to vector<8x32xf32>
    %415 = arith.addf %414, %413 : vector<8x32xf32>
    %416 = arith.divf %414, %415 : vector<8x32xf32>
    %417 = arith.mulf %408, %391 : vector<8x32xf32>
    %418 = arith.mulf %402, %410 : vector<8x32xf32>
    %419 = arith.addf %417, %418 : vector<8x32xf32>
    %420 = math.tanh %419 : vector<8x32xf32>
    %421 = arith.mulf %416, %420 : vector<8x32xf32>
    %422 = vector.extract_strided_slice %296 {offsets = [32, 0], sizes = [8, 128], strides = [1, 1]} : vector<64x128xf32> to vector<8x128xf32>
    %cst_141 = arith.constant dense<0.000000e+00> : vector<8x128xf32>
    %423 = tpu.matmul %421, %307, %cst_141 {dimension_numbers = #tpu.dot_dimension_numbers<[1], [0], [0], [1], [0, 0, 1, 1], [], []>} : vector<8x32xf32>, vector<32x128xf32>, vector<8x128xf32> -> vector<8x128xf32>
    %424 = arith.addf %422, %423 : vector<8x128xf32>
    %425 = vector.extract_strided_slice %424 {offsets = [0, 0], sizes = [8, 32], strides = [1, 1]} : vector<8x128xf32> to vector<8x32xf32>
    %426 = arith.negf %425 : vector<8x32xf32>
    %427 = math.exp %426 : vector<8x32xf32>
    %cst_142 = arith.constant 1.000000e+00 : f32
    %428 = vector.broadcast %cst_142 : f32 to vector<8x32xf32>
    %429 = arith.addf %428, %427 : vector<8x32xf32>
    %430 = arith.divf %428, %429 : vector<8x32xf32>
    %431 = vector.extract_strided_slice %424 {offsets = [0, 32], sizes = [8, 32], strides = [1, 1]} : vector<8x128xf32> to vector<8x32xf32>
    %432 = arith.negf %431 : vector<8x32xf32>
    %433 = math.exp %432 : vector<8x32xf32>
    %cst_143 = arith.constant 1.000000e+00 : f32
    %434 = vector.broadcast %cst_143 : f32 to vector<8x32xf32>
    %435 = arith.addf %434, %433 : vector<8x32xf32>
    %436 = arith.divf %434, %435 : vector<8x32xf32>
    %437 = vector.extract_strided_slice %424 {offsets = [0, 64], sizes = [8, 32], strides = [1, 1]} : vector<8x128xf32> to vector<8x32xf32>
    %438 = math.tanh %437 : vector<8x32xf32>
    %439 = vector.extract_strided_slice %424 {offsets = [0, 96], sizes = [8, 32], strides = [1, 1]} : vector<8x128xf32> to vector<8x32xf32>
    %440 = arith.negf %439 : vector<8x32xf32>
    %441 = math.exp %440 : vector<8x32xf32>
    %cst_144 = arith.constant 1.000000e+00 : f32
    %442 = vector.broadcast %cst_144 : f32 to vector<8x32xf32>
    %443 = arith.addf %442, %441 : vector<8x32xf32>
    %444 = arith.divf %442, %443 : vector<8x32xf32>
    %445 = arith.mulf %436, %419 : vector<8x32xf32>
    %446 = arith.mulf %430, %438 : vector<8x32xf32>
    %447 = arith.addf %445, %446 : vector<8x32xf32>
    %448 = math.tanh %447 : vector<8x32xf32>
    %449 = arith.mulf %444, %448 : vector<8x32xf32>
    %450 = vector.extract_strided_slice %296 {offsets = [40, 0], sizes = [8, 128], strides = [1, 1]} : vector<64x128xf32> to vector<8x128xf32>
    %cst_145 = arith.constant dense<0.000000e+00> : vector<8x128xf32>
    %451 = tpu.matmul %449, %307, %cst_145 {dimension_numbers = #tpu.dot_dimension_numbers<[1], [0], [0], [1], [0, 0, 1, 1], [], []>} : vector<8x32xf32>, vector<32x128xf32>, vector<8x128xf32> -> vector<8x128xf32>
    %452 = arith.addf %450, %451 : vector<8x128xf32>
    %453 = vector.extract_strided_slice %452 {offsets = [0, 0], sizes = [8, 32], strides = [1, 1]} : vector<8x128xf32> to vector<8x32xf32>
    %454 = arith.negf %453 : vector<8x32xf32>
    %455 = math.exp %454 : vector<8x32xf32>
    %cst_146 = arith.constant 1.000000e+00 : f32
    %456 = vector.broadcast %cst_146 : f32 to vector<8x32xf32>
    %457 = arith.addf %456, %455 : vector<8x32xf32>
    %458 = arith.divf %456, %457 : vector<8x32xf32>
    %459 = vector.extract_strided_slice %452 {offsets = [0, 32], sizes = [8, 32], strides = [1, 1]} : vector<8x128xf32> to vector<8x32xf32>
    %460 = arith.negf %459 : vector<8x32xf32>
    %461 = math.exp %460 : vector<8x32xf32>
    %cst_147 = arith.constant 1.000000e+00 : f32
    %462 = vector.broadcast %cst_147 : f32 to vector<8x32xf32>
    %463 = arith.addf %462, %461 : vector<8x32xf32>
    %464 = arith.divf %462, %463 : vector<8x32xf32>
    %465 = vector.extract_strided_slice %452 {offsets = [0, 64], sizes = [8, 32], strides = [1, 1]} : vector<8x128xf32> to vector<8x32xf32>
    %466 = math.tanh %465 : vector<8x32xf32>
    %467 = vector.extract_strided_slice %452 {offsets = [0, 96], sizes = [8, 32], strides = [1, 1]} : vector<8x128xf32> to vector<8x32xf32>
    %468 = arith.negf %467 : vector<8x32xf32>
    %469 = math.exp %468 : vector<8x32xf32>
    %cst_148 = arith.constant 1.000000e+00 : f32
    %470 = vector.broadcast %cst_148 : f32 to vector<8x32xf32>
    %471 = arith.addf %470, %469 : vector<8x32xf32>
    %472 = arith.divf %470, %471 : vector<8x32xf32>
    %473 = arith.mulf %464, %447 : vector<8x32xf32>
    %474 = arith.mulf %458, %466 : vector<8x32xf32>
    %475 = arith.addf %473, %474 : vector<8x32xf32>
    %476 = math.tanh %475 : vector<8x32xf32>
    %477 = arith.mulf %472, %476 : vector<8x32xf32>
    %478 = vector.extract_strided_slice %296 {offsets = [48, 0], sizes = [8, 128], strides = [1, 1]} : vector<64x128xf32> to vector<8x128xf32>
    %cst_149 = arith.constant dense<0.000000e+00> : vector<8x128xf32>
    %479 = tpu.matmul %477, %307, %cst_149 {dimension_numbers = #tpu.dot_dimension_numbers<[1], [0], [0], [1], [0, 0, 1, 1], [], []>} : vector<8x32xf32>, vector<32x128xf32>, vector<8x128xf32> -> vector<8x128xf32>
    %480 = arith.addf %478, %479 : vector<8x128xf32>
    %481 = vector.extract_strided_slice %480 {offsets = [0, 0], sizes = [8, 32], strides = [1, 1]} : vector<8x128xf32> to vector<8x32xf32>
    %482 = arith.negf %481 : vector<8x32xf32>
    %483 = math.exp %482 : vector<8x32xf32>
    %cst_150 = arith.constant 1.000000e+00 : f32
    %484 = vector.broadcast %cst_150 : f32 to vector<8x32xf32>
    %485 = arith.addf %484, %483 : vector<8x32xf32>
    %486 = arith.divf %484, %485 : vector<8x32xf32>
    %487 = vector.extract_strided_slice %480 {offsets = [0, 32], sizes = [8, 32], strides = [1, 1]} : vector<8x128xf32> to vector<8x32xf32>
    %488 = arith.negf %487 : vector<8x32xf32>
    %489 = math.exp %488 : vector<8x32xf32>
    %cst_151 = arith.constant 1.000000e+00 : f32
    %490 = vector.broadcast %cst_151 : f32 to vector<8x32xf32>
    %491 = arith.addf %490, %489 : vector<8x32xf32>
    %492 = arith.divf %490, %491 : vector<8x32xf32>
    %493 = vector.extract_strided_slice %480 {offsets = [0, 64], sizes = [8, 32], strides = [1, 1]} : vector<8x128xf32> to vector<8x32xf32>
    %494 = math.tanh %493 : vector<8x32xf32>
    %495 = vector.extract_strided_slice %480 {offsets = [0, 96], sizes = [8, 32], strides = [1, 1]} : vector<8x128xf32> to vector<8x32xf32>
    %496 = arith.negf %495 : vector<8x32xf32>
    %497 = math.exp %496 : vector<8x32xf32>
    %cst_152 = arith.constant 1.000000e+00 : f32
    %498 = vector.broadcast %cst_152 : f32 to vector<8x32xf32>
    %499 = arith.addf %498, %497 : vector<8x32xf32>
    %500 = arith.divf %498, %499 : vector<8x32xf32>
    %501 = arith.mulf %492, %475 : vector<8x32xf32>
    %502 = arith.mulf %486, %494 : vector<8x32xf32>
    %503 = arith.addf %501, %502 : vector<8x32xf32>
    %504 = math.tanh %503 : vector<8x32xf32>
    %505 = arith.mulf %500, %504 : vector<8x32xf32>
    %506 = vector.extract_strided_slice %296 {offsets = [56, 0], sizes = [8, 128], strides = [1, 1]} : vector<64x128xf32> to vector<8x128xf32>
    %cst_153 = arith.constant dense<0.000000e+00> : vector<8x128xf32>
    %507 = tpu.matmul %505, %307, %cst_153 {dimension_numbers = #tpu.dot_dimension_numbers<[1], [0], [0], [1], [0, 0, 1, 1], [], []>} : vector<8x32xf32>, vector<32x128xf32>, vector<8x128xf32> -> vector<8x128xf32>
    %508 = arith.addf %506, %507 : vector<8x128xf32>
    %509 = vector.extract_strided_slice %508 {offsets = [0, 0], sizes = [8, 32], strides = [1, 1]} : vector<8x128xf32> to vector<8x32xf32>
    %510 = arith.negf %509 : vector<8x32xf32>
    %511 = math.exp %510 : vector<8x32xf32>
    %cst_154 = arith.constant 1.000000e+00 : f32
    %512 = vector.broadcast %cst_154 : f32 to vector<8x32xf32>
    %513 = arith.addf %512, %511 : vector<8x32xf32>
    %514 = arith.divf %512, %513 : vector<8x32xf32>
    %515 = vector.extract_strided_slice %508 {offsets = [0, 32], sizes = [8, 32], strides = [1, 1]} : vector<8x128xf32> to vector<8x32xf32>
    %516 = arith.negf %515 : vector<8x32xf32>
    %517 = math.exp %516 : vector<8x32xf32>
    %cst_155 = arith.constant 1.000000e+00 : f32
    %518 = vector.broadcast %cst_155 : f32 to vector<8x32xf32>
    %519 = arith.addf %518, %517 : vector<8x32xf32>
    %520 = arith.divf %518, %519 : vector<8x32xf32>
    %521 = vector.extract_strided_slice %508 {offsets = [0, 64], sizes = [8, 32], strides = [1, 1]} : vector<8x128xf32> to vector<8x32xf32>
    %522 = math.tanh %521 : vector<8x32xf32>
    %523 = vector.extract_strided_slice %508 {offsets = [0, 96], sizes = [8, 32], strides = [1, 1]} : vector<8x128xf32> to vector<8x32xf32>
    %524 = arith.negf %523 : vector<8x32xf32>
    %525 = math.exp %524 : vector<8x32xf32>
    %cst_156 = arith.constant 1.000000e+00 : f32
    %526 = vector.broadcast %cst_156 : f32 to vector<8x32xf32>
    %527 = arith.addf %526, %525 : vector<8x32xf32>
    %528 = arith.divf %526, %527 : vector<8x32xf32>
    %529 = arith.mulf %520, %503 : vector<8x32xf32>
    %530 = arith.mulf %514, %522 : vector<8x32xf32>
    %531 = arith.addf %529, %530 : vector<8x32xf32>
    %532 = math.tanh %531 : vector<8x32xf32>
    %533 = arith.mulf %528, %532 : vector<8x32xf32>
    %534 = vector.extract_strided_slice %306 {offsets = [0, 0], sizes = [8, 32], strides = [1, 1]} : vector<8x128xf32> to vector<8x32xf32>
    %535 = arith.negf %534 : vector<8x32xf32>
    %536 = math.exp %535 : vector<8x32xf32>
    %cst_157 = arith.constant 1.000000e+00 : f32
    %537 = vector.broadcast %cst_157 : f32 to vector<8x32xf32>
    %538 = arith.addf %537, %536 : vector<8x32xf32>
    %539 = arith.divf %537, %538 : vector<8x32xf32>
    %540 = vector.extract_strided_slice %306 {offsets = [0, 64], sizes = [8, 32], strides = [1, 1]} : vector<8x128xf32> to vector<8x32xf32>
    %541 = math.tanh %540 : vector<8x32xf32>
    %542 = vector.extract_strided_slice %306 {offsets = [0, 96], sizes = [8, 32], strides = [1, 1]} : vector<8x128xf32> to vector<8x32xf32>
    %543 = arith.negf %542 : vector<8x32xf32>
    %544 = math.exp %543 : vector<8x32xf32>
    %cst_158 = arith.constant 1.000000e+00 : f32
    %545 = vector.broadcast %cst_158 : f32 to vector<8x32xf32>
    %546 = arith.addf %545, %544 : vector<8x32xf32>
    %547 = arith.divf %545, %546 : vector<8x32xf32>
    %548 = arith.mulf %539, %541 : vector<8x32xf32>
    %549 = math.tanh %548 : vector<8x32xf32>
    %550 = arith.mulf %547, %549 : vector<8x32xf32>
    %c0_159 = arith.constant 0 : index
    %c0_160 = arith.constant 0 : index
    %551 = vector.load %arg11[%c0_159, %c0_160] : memref<64x5xf32, #tpu.memory_space<vmem>>, vector<64x5xf32>
    %552 = vector.extract_strided_slice %551 {offsets = [0, 0], sizes = [32, 5], strides = [1, 1]} : vector<64x5xf32> to vector<32x5xf32>
    %cst_161 = arith.constant dense<0.000000e+00> : vector<8x5xf32>
    %553 = tpu.matmul %533, %552, %cst_161 {dimension_numbers = #tpu.dot_dimension_numbers<[1], [0], [0], [1], [0, 0, 1, 1], [], []>} : vector<8x32xf32>, vector<32x5xf32>, vector<8x5xf32> -> vector<8x5xf32>
    %554 = vector.extract_strided_slice %551 {offsets = [32, 0], sizes = [32, 5], strides = [1, 1]} : vector<64x5xf32> to vector<32x5xf32>
    %cst_162 = arith.constant dense<0.000000e+00> : vector<8x5xf32>
    %555 = tpu.matmul %550, %554, %cst_162 {dimension_numbers = #tpu.dot_dimension_numbers<[1], [0], [0], [1], [0, 0, 1, 1], [], []>} : vector<8x32xf32>, vector<32x5xf32>, vector<8x5xf32> -> vector<8x5xf32>
    %556 = arith.addf %553, %555 : vector<8x5xf32>
    %c0_163 = arith.constant 0 : index
    %c0_164 = arith.constant 0 : index
    %557 = vector.load %arg12[%c0_163, %c0_164] : memref<1x5xf32, #tpu.memory_space<vmem>>, vector<1x5xf32>
    %558 = vector.broadcast %557 : vector<1x5xf32> to vector<8x5xf32>
    %559 = arith.addf %556, %558 : vector<8x5xf32>
    %c0_165 = arith.constant 0 : index
    %c0_166 = arith.constant 0 : index
    %560 = vector.load %arg13[%c0_165, %c0_166] : memref<8x5xf32, #tpu.memory_space<vmem>>, vector<8x5xf32>
    tpu.vector_store %arg13[%c0_165, %c0_166], %559 {strides = array<i32>} : memref<8x5xf32, #tpu.memory_space<vmem>>, vector<8x5xf32>,
    return
  }
  func.func @transform_0(%arg0: i32) -> (i32, i32) {
    %c0_i32 = arith.constant 0 : i32
    %c0_i32_0 = arith.constant 0 : i32
    %c0_i32_1 = arith.constant 0 : i32
    return %c0_i32, %c0_i32_0 : i32, i32
  }
  func.func @transform_1(%arg0: i32) -> (i32, i32) {
    %c0_i32 = arith.constant 0 : i32
    %c0_i32_0 = arith.constant 0 : i32
    %c0_i32_1 = arith.constant 0 : i32
    return %c0_i32, %c0_i32_0 : i32, i32
  }
  func.func @transform_2(%arg0: i32) -> (i32, i32) {
    %c0_i32 = arith.constant 0 : i32
    %c0_i32_0 = arith.constant 0 : i32
    %c0_i32_1 = arith.constant 0 : i32
    return %c0_i32, %c0_i32_0 : i32, i32
  }
  func.func @transform_3(%arg0: i32) -> (i32, i32) {
    %c0_i32 = arith.constant 0 : i32
    %c0_i32_0 = arith.constant 0 : i32
    %c0_i32_1 = arith.constant 0 : i32
    return %c0_i32, %c0_i32_0 : i32, i32
  }
  func.func @transform_4(%arg0: i32) -> (i32, i32) {
    %c0_i32 = arith.constant 0 : i32
    %c0_i32_0 = arith.constant 0 : i32
    %c0_i32_1 = arith.constant 0 : i32
    return %c0_i32, %c0_i32_0 : i32, i32
  }
  func.func @transform_5(%arg0: i32) -> (i32, i32) {
    %c0_i32 = arith.constant 0 : i32
    %c0_i32_0 = arith.constant 0 : i32
    %c0_i32_1 = arith.constant 0 : i32
    return %c0_i32, %c0_i32_0 : i32, i32
  }
  func.func @transform_6(%arg0: i32) -> (i32, i32) {
    %c0_i32 = arith.constant 0 : i32
    %c0_i32_0 = arith.constant 0 : i32
    %c0_i32_1 = arith.constant 0 : i32
    return %c0_i32, %c0_i32_0 : i32, i32
  }
  func.func @transform_7(%arg0: i32) -> (i32, i32) {
    %c0_i32 = arith.constant 0 : i32
    %c0_i32_0 = arith.constant 0 : i32
    %c0_i32_1 = arith.constant 0 : i32
    return %c0_i32, %c0_i32_0 : i32, i32
  }
  func.func @transform_8(%arg0: i32) -> (i32, i32) {
    %c0_i32 = arith.constant 0 : i32
    %c0_i32_0 = arith.constant 0 : i32
    %c0_i32_1 = arith.constant 0 : i32
    return %c0_i32, %c0_i32_0 : i32, i32
  }
  func.func @transform_9(%arg0: i32) -> (i32, i32) {
    %c0_i32 = arith.constant 0 : i32
    %c0_i32_0 = arith.constant 0 : i32
    %c0_i32_1 = arith.constant 0 : i32
    return %c0_i32, %c0_i32_0 : i32, i32
  }
  func.func @transform_10(%arg0: i32) -> (i32, i32) {
    %c0_i32 = arith.constant 0 : i32
    %c0_i32_0 = arith.constant 0 : i32
    %c0_i32_1 = arith.constant 0 : i32
    return %c0_i32, %c0_i32_0 : i32, i32
  }
  func.func @transform_11(%arg0: i32) -> (i32, i32) {
    %c0_i32 = arith.constant 0 : i32
    %c0_i32_0 = arith.constant 0 : i32
    %c0_i32_1 = arith.constant 0 : i32
    return %c0_i32, %c0_i32_0 : i32, i32
  }
  func.func @transform_12(%arg0: i32) -> (i32, i32) {
    %c0_i32 = arith.constant 0 : i32
    %c0_i32_0 = arith.constant 0 : i32
    %c0_i32_1 = arith.constant 0 : i32
    return %c0_i32, %c0_i32_0 : i32, i32
  }
}

</mosaic_0001>

<bundles_post_ra>
// kernel: text_rnn_forward.1
= control target key start
LH: loop header
LB: loop body
LE: loop exit
PB: predicated region body
PF: predicated region fallthrough
CT: control target
= control target key end

     0   :  { %v3225_v3 = vmov 0.0   ;;  %vm69_vm0 = vcmask 261120   ;;  %v59_v41 = vlaneseq  ;;  %vm382_vm1 = vcmask 523264   ;;  %s3227_s13 = smov 32   ;;  %s3229_s23 = smov 96   ;;  %s4064_s1 = inlined_call_operand.vmem [shape: f32[32,256], index: 1, kind: input, shape index: {}]   ;;  %s4065_s2 = inlined_call_operand.vmem [shape: f32[32,256], index: 2, kind: input, shape index: {}]   ;;  %s4066_s0 = inlined_call_operand.vmem [shape: f32[64,32], index: 0, kind: input, shape index: {}]   ;;  %s4067_s4 = inlined_call_operand.vmem [shape: f32[64,256], index: 4, kind: input, shape index: {}]   ;;  %s4068_s3 = inlined_call_operand.vmem [shape: f32[1,256], index: 3, kind: input, shape index: {}]   ;;  %s4069_s5 = inlined_call_operand.vmem [shape: f32[64,128], index: 5, kind: input, shape index: {}]   ;;  %s4070_s8 = inlined_call_operand.vmem [shape: f32[64,128], index: 8, kind: input, shape index: {}]   ;;  %s4071_s6 = inlined_call_operand.vmem [shape: f32[32,128], index: 6, kind: input, shape index: {}]   ;;  %s4072_s7 = inlined_call_operand.vmem [shape: f32[1,128], index: 7, kind: input, shape index: {}]   ;;  %s4073_s9 = inlined_call_operand.vmem [shape: f32[1,128], index: 9, kind: input, shape index: {}]   ;;  %s4074_s10 = inlined_call_operand.vmem [shape: f32[64,5], index: 10, kind: input, shape index: {}]   ;;  %s4075_s11 = inlined_call_operand.vmem [shape: f32[1,5], index: 11, kind: input, shape index: {}]   ;;  %s4076_s12 = inlined_call_operand.vmem [shape: f32[8,5], index: 12, kind: output, shape index: {}]  }
   0x1   :  { %v56_v0 = vld [vmem:[%s4064_s1 + $0x38] sm:$0xff]  ;;  %v55_v2 = vld [vmem:[%s4064_s1 + $0x30] sm:$0xff]  ;;  %158 = vmatprep.mubr.f32.mxu0 %v3225_v3  ;;  %295 = vmatprep.mubr.f32.mxu1 %v3225_v3  ;;  %v54_v5 = vld [vmem:[%s4064_s1 + $0x28] sm:$0xff]  ;;  %vm3228_vm2 = vmmov 0   ;;  %vm2712_vm3 = vcmask 39936  }
   0x2   :  { %v230_v1 = vld [vmem:[%s4065_s2 + $0x38] sm:$0xff]  ;;  %118 = vmatprep.subr.mxu0 %v56_v0  ;;  %v229_v4 = vld [vmem:[%s4065_s2 + $0x30] sm:$0xff]  ;;  %v228_v6 = vld [vmem:[%s4065_s2 + $0x28] sm:$0xff]  ;;  %v60_v42 = vshrl.u32 %v59_v41, 7 }
   0x3   :  { %255 = vmatprep.subr.mxu1 %v230_v1  ;;  %119 = vmatpush1.msra.mxu0 %v55_v2  ;;  %v53_v7 = vld [vmem:[%s4064_s1 + $0x20] sm:$0xff]  ;;  %v52_v9 = vld [vmem:[%s4064_s1 + $0x18] sm:$0xff]  ;;  %v51_v11 = vld [vmem:[%s4064_s1 + $0x10] sm:$0xff] }
   0x4   :  { %256 = vmatpush1.msra.mxu1 %v229_v4  ;;  %v227_v8 = vld [vmem:[%s4065_s2 + $0x20] sm:$0xff]  ;;  %120 = vmatprep.subr.mxu0 %v54_v5  ;;  %v226_v10 = vld [vmem:[%s4065_s2 + $0x18] sm:$0xff]  ;;  %v225_v12 = vld [vmem:[%s4065_s2 + $0x10] sm:$0xff]  ;;  %v61_v43 = vsub.s32 0, %v60_v42  ;;  %v65_v47 = vsub.s32 1, %v60_v42 }
   0x5   :  { %257 = vmatprep.subr.mxu1 %v228_v6  ;;  %121 = vmatpush1.msra.mxu0 %v53_v7  ;;  %v50_v13 = vld [vmem:[%s4064_s1 + $0x8] sm:$0xff]  ;;  %v49_v15 = vld [vmem:[%s4064_s1] sm:$0xff]  ;;  %v3351_v18 = vld [vmem:[%s4067_s4 + $0x78] sm:$0xff] }
   0x6   :  { %258 = vmatpush1.msra.mxu1 %v227_v8  ;;  %v224_v14 = vld [vmem:[%s4065_s2 + $0x8] sm:$0xff]  ;;  %122 = vmatprep.subr.mxu0 %v52_v9  ;;  %v223_v16 = vld [vmem:[%s4065_s2] sm:$0xff]  ;;  %v3356_v19 = vld [vmem:[%s4067_s4 + $0x70] sm:$0xff] }
   0x7   :  { %259 = vmatprep.subr.mxu1 %v226_v10  ;;  %123 = vmatpush1.msra.mxu0 %v51_v11  ;;  %v41_v17 = vld [vmem:[%s4066_s0] sm:$0xff]  ;;  %v3363_v20 = vld [vmem:[%s4067_s4 + $0x68] sm:$0xff]  ;;  %v3381_v23 = vld [vmem:[%s4067_s4 + $0x58] sm:$0xff] }
   0x8   :  { %260 = vmatpush1.msra.mxu1 %v225_v12  ;;  %124 = vmatprep.subr.mxu0 %v50_v13  ;;  %v42_v21 = vld [vmem:[%s4066_s0 + $0x8] sm:$0xff]  ;;  %v3375_v22 = vld [vmem:[%s4067_s4 + $0x60] sm:$0xff]  ;;  %v3389_v24 = vld [vmem:[%s4067_s4 + $0x50] sm:$0xff] }
   0x9   :  { %261 = vmatprep.subr.mxu1 %v224_v14  ;;  %125 = vmatpush1.msra.mxu0 %v49_v15  ;;  %v43_v25 = vld [vmem:[%s4066_s0 + $0x10] sm:$0xff]  ;;  %v3402_v26 = vld [vmem:[%s4067_s4 + $0x48] sm:$0xff]  ;;  %v3410_v27 = vld [vmem:[%s4067_s4 + $0x40] sm:$0xff] }
   0xa   :  { %262 = vmatpush1.msra.mxu1 %v223_v16  ;;  %2718 = vmatmul.mubr.msk.f32.vlgmr.msra.gmra.mxu0 %vm69_vm0, %v41_v17  ;;  %v44_v28 = vld [vmem:[%s4066_s0 + $0x18] sm:$0xff]  ;;  %v3431_v30 = vld [vmem:[%s4067_s4 + $0x30] sm:$0xff]  ;;  %v45_v31 = vld [vmem:[%s4066_s0 + $0x20] sm:$0xff] }
   0xb   :  { %2726 = vmatmul.mubr.msk.f32.vlgmr.msra.gmra.mxu1 %vm69_vm0, %v41_v17  ;;  %402 = vmatprep.subr.mxu0 %v3351_v18  ;;  %v3423_v29 = vld [vmem:[%s4067_s4 + $0x38] sm:$0xff]  ;;  %v3444_v32 = vld [vmem:[%s4067_s4 + $0x28] sm:$0xff]  ;;  %v3452_v33 = vld [vmem:[%s4067_s4 + $0x20] sm:$0xff] }
   0xc   :  { %164 = vmatprep.mubr.f32.mxu0 %v3225_v3  ;;  %403 = vmatpush1.msra.mxu0 %v3356_v19  ;;  %v46_v34 = vld [vmem:[%s4066_s0 + $0x28] sm:$0xff]  ;;  %v3465_v35 = vld [vmem:[%s4067_s4 + $0x18] sm:$0xff]  ;;  %v3473_v36 = vld [vmem:[%s4067_s4 + $0x10] sm:$0xff] }
   0xd   :  { %301 = vmatprep.mubr.f32.mxu1 %v3225_v3  ;;  %404 = vmatprep.subr.mxu0 %v3363_v20  ;;  %v47_v37 = vld [vmem:[%s4066_s0 + $0x30] sm:$0xff]  ;;  %v3486_v38 = vld [vmem:[%s4067_s4 + $0x8] sm:$0xff]  ;;  %v3494_v39 = vld [vmem:[%s4067_s4] sm:$0xff] }
   0xe   :  { %514 = vmatprep.subr.mxu1 %v3351_v18  ;;  %2719 = vmatmul.mubr.msk.f32.gmra.mxu0 %vm69_vm0, %v42_v21  ;;  %v48_v40 = vld [vmem:[%s4066_s0 + $0x38] sm:$0xff]  ;;  %v57_v44 = vld [vmem:[%s4068_s3] sm:$0x3]  ;;  %s3226_s3 = smov 64  }
   0xf   :  { %2727 = vmatmul.mubr.msk.f32.gmra.mxu1 %vm69_vm0, %v42_v21  ;;  %405 = vmatpush1.msra.mxu0 %v3375_v22  ;;  %v62_v50 = vrot.slane %v57_v44, %v61_v43  ;;  %v66_v53 = vrot.slane %v57_v44, %v65_v47 }
  0x10   :  { %170 = vmatprep.mubr.f32.mxu0 %v3225_v3  ;;  %307 = vmatprep.mubr.f32.mxu1 %v3225_v3 }
  0x11   :  { %406 = vmatprep.subr.mxu0 %v3381_v23  ;;  %515 = vmatpush1.msra.mxu1 %v3356_v19 }
  0x12   :  { %407 = vmatpush1.msra.mxu0 %v3389_v24  ;;  %516 = vmatprep.subr.mxu1 %v3363_v20 }
  0x13   :  { %2720 = vmatmul.mubr.msk.f32.gmra.mxu0 %vm69_vm0, %v43_v25  ;;  %2728 = vmatmul.mubr.msk.f32.gmra.mxu1 %vm69_vm0, %v43_v25 }
  0x14   :  { %176 = vmatprep.mubr.f32.mxu0 %v3225_v3  ;;  %313 = vmatprep.mubr.f32.mxu1 %v3225_v3 }
  0x15   :  { %408 = vmatprep.subr.mxu0 %v3402_v26  ;;  %517 = vmatpush1.msra.mxu1 %v3375_v22 }
  0x16   :  { %409 = vmatpush1.msra.mxu0 %v3410_v27  ;;  %518 = vmatprep.subr.mxu1 %v3381_v23 }
  0x17   :  { %2721 = vmatmul.mubr.msk.f32.gmra.mxu0 %vm69_vm0, %v44_v28  ;;  %2729 = vmatmul.mubr.msk.f32.gmra.mxu1 %vm69_vm0, %v44_v28 }
  0x18   :  { %182 = vmatprep.mubr.f32.mxu0 %v3225_v3  ;;  %319 = vmatprep.mubr.f32.mxu1 %v3225_v3 }
  0x19   :  { %410 = vmatprep.subr.mxu0 %v3423_v29  ;;  %519 = vmatpush1.msra.mxu1 %v3389_v24 }
  0x1a   :  { %411 = vmatpush1.msra.mxu0 %v3431_v30  ;;  %520 = vmatprep.subr.mxu1 %v3402_v26 }
  0x1b   :  { %2722 = vmatmul.mubr.msk.f32.gmra.mxu0 %vm69_vm0, %v45_v31  ;;  %2730 = vmatmul.mubr.msk.f32.gmra.mxu1 %vm69_vm0, %v45_v31 }
  0x1c   :  { %188 = vmatprep.mubr.f32.mxu0 %v3225_v3  ;;  %325 = vmatprep.mubr.f32.mxu1 %v3225_v3 }
  0x1d   :  { %412 = vmatprep.subr.mxu0 %v3444_v32  ;;  %521 = vmatpush1.msra.mxu1 %v3410_v27 }
  0x1e   :  { %413 = vmatpush1.msra.mxu0 %v3452_v33  ;;  %522 = vmatprep.subr.mxu1 %v3423_v29 }
  0x1f   :  { %2723 = vmatmul.mubr.msk.f32.gmra.mxu0 %vm69_vm0, %v46_v34  ;;  %2731 = vmatmul.mubr.msk.f32.gmra.mxu1 %vm69_vm0, %v46_v34 }
  0x20   :  { %194 = vmatprep.mubr.f32.mxu0 %v3225_v3  ;;  %331 = vmatprep.mubr.f32.mxu1 %v3225_v3 }
  0x21   :  { %414 = vmatprep.subr.mxu0 %v3465_v35  ;;  %523 = vmatpush1.msra.mxu1 %v3431_v30 }
  0x22   :  { %415 = vmatpush1.msra.mxu0 %v3473_v36  ;;  %524 = vmatprep.subr.mxu1 %v3444_v32 }
  0x23   :  { %2724 = vmatmul.mubr.msk.f32.gmra.mxu0 %vm69_vm0, %v47_v37  ;;  %2732 = vmatmul.mubr.msk.f32.gmra.mxu1 %vm69_vm0, %v47_v37 }
  0x24   :  { %200 = vmatprep.mubr.f32.mxu0 %v3225_v3  ;;  %337 = vmatprep.mubr.f32.mxu1 %v3225_v3 }
  0x25   :  { %416 = vmatprep.subr.mxu0 %v3486_v38  ;;  %525 = vmatpush1.msra.mxu1 %v3452_v33 }
  0x26   :  { %417 = vmatpush1.msra.mxu0 %v3494_v39  ;;  %526 = vmatprep.subr.mxu1 %v3465_v35 }
  0x27   :  { %2725 = vmatmul.mubr.msk.f32.gmra.mxu0 %vm69_vm0, %v48_v40  ;;  %2733 = vmatmul.mubr.msk.f32.gmra.mxu1 %vm69_vm0, %v48_v40 }
  0x28   :  { %450 = vmatprep.mubr.f32.mxu0 %v3225_v3  ;;  %527 = vmatpush1.msra.mxu1 %v3473_v36 }
  0x29   :  { %562 = vmatprep.mubr.f32.mxu1 %v3225_v3  ;;  %528 = vmatprep.subr.mxu1 %v3486_v38 }
  0x2a   :  { %626 = vmatprep.subr.mxu0 %v3351_v18  ;;  %529 = vmatpush1.msra.mxu1 %v3494_v39 }
  0x2b   :  { %451 = vmatmul.mubr.f32.vlgmr.msra.gmra.mxu0 %v3225_v3  ;;  %738 = vmatprep.subr.mxu1 %v3351_v18 }
  0x2c   :  { %627 = vmatpush1.msra.mxu0 %v3356_v19  ;;  %674 = vmatprep.mubr.f32.mxu0 %v3225_v3 }
  0x2d   :  { %628 = vmatprep.subr.mxu0 %v3363_v20 }
  0x2e   :  { %629 = vmatpush1.msra.mxu0 %v3375_v22 }
  0x2f   :  { %630 = vmatprep.subr.mxu0 %v3381_v23 }
  0x30   :  { %631 = vmatpush1.msra.mxu0 %v3389_v24 }
  0x31   :  { %632 = vmatprep.subr.mxu0 %v3402_v26 }
  0x32   :  { %633 = vmatpush1.msra.mxu0 %v3410_v27 }
  0x33   :  { %634 = vmatprep.subr.mxu0 %v3423_v29 }
  0x34   :  { %635 = vmatpush1.msra.mxu0 %v3431_v30 }
  0x35   :  { %636 = vmatprep.subr.mxu0 %v3444_v32 }
  0x36   :  { %637 = vmatpush1.msra.mxu0 %v3452_v33 }
  0x37   :  { %638 = vmatprep.subr.mxu0 %v3465_v35 }
  0x38   :  { %639 = vmatpush1.msra.mxu0 %v3473_v36 }
  0x39   :  { %640 = vmatprep.subr.mxu0 %v3486_v38 }
  0x3a   :  { %641 = vmatpush1.msra.mxu0 %v3494_v39 }
  0x3b   :  { %850 = vmatprep.subr.mxu0 %v3351_v18 }
  0xca   :  { %v160_v45 = vpop.f32.mrf.mxu0 }
  0xcb   :  { %v297_v46 = vpop.f32.mrf.mxu1 }
  0xcc   :  { %v3536_v48 = vpop.f32.mrf.mxu0 }
  0xcd   :  { %v299_v49 = vpop.f32.mrf.mxu1 }
  0xce   :  { %v166_v51 = vpop.f32.mrf.mxu0 }
  0xcf   :  { %v303_v52 = vpop.f32.mrf.mxu1  ;;  %v167_v54 = vadd.f32 %v166_v51, %v62_v50 }
  0xd0   :  { %v168_v55 = vpop.f32.mrf.mxu0 }
  0xd1   :  { %v305_v56 = vpop.f32.mrf.mxu1  ;;  %v169_v57 = vadd.f32 %v168_v55, %v66_v53 }
  0xd3   :  { %v172_v58 = vpop.f32.mrf.mxu0  ;;  %v309_v59 = vpop.f32.mrf.mxu1 }
  0xd4   :  { %v173_v60 = vadd.f32 %v172_v58, %v62_v50 }
  0xd5   :  { %v174_v61 = vpop.f32.mrf.mxu0  ;;  %v311_v62 = vpop.f32.mrf.mxu1 }
  0xd6   :  { %v175_v63 = vadd.f32 %v174_v61, %v66_v53 }
  0xd7   :  { %v178_v0 = vpop.f32.mrf.mxu0  ;;  %v315_v1 = vpop.f32.mrf.mxu1 }
  0xd8   :  { %v179_v2 = vadd.f32 %v178_v0, %v62_v50 }
  0xd9   :  { %v180_v4 = vpop.f32.mrf.mxu0  ;;  %v317_v5 = vpop.f32.mrf.mxu1 }
  0xda   :  { %v181_v6 = vadd.f32 %v180_v4, %v66_v53 }
  0xdb   :  { %v184_v7 = vpop.f32.mrf.mxu0  ;;  %v321_v8 = vpop.f32.mrf.mxu1 }
  0xdc   :  { %v185_v9 = vadd.f32 %v184_v7, %v62_v50  ;;  %v3538_v10 = vadd.f32 %v321_v8, %v179_v2 }
  0xdd   :  { %v186_v11 = vpop.f32.mrf.mxu0  ;;  %v323_v12 = vpop.f32.mrf.mxu1 }
  0xde   :  { %v187_v13 = vadd.f32 %v186_v11, %v66_v53  ;;  %v3540_v14 = vadd.f32 %v323_v12, %v181_v6  ;;  %v3542_v15 = vadd.f32 %v315_v1, %v185_v9 }
  0xdf   :  { %v190_v16 = vpop.f32.mrf.mxu0  ;;  %v327_v17 = vpop.f32.mrf.mxu1 }
  0xe0   :  { %v191_v21 = vadd.f32 %v190_v16, %v62_v50  ;;  %v3544_v25 = vadd.f32 %v327_v17, %v173_v60  ;;  %v3546_v28 = vadd.f32 %v317_v5, %v187_v13 }
  0xe1   :  { %v192_v31 = vpop.f32.mrf.mxu0  ;;  %v329_v34 = vpop.f32.mrf.mxu1 }
  0xe2   :  { %v193_v37 = vadd.f32 %v192_v31, %v66_v53  ;;  %v3548_v40 = vadd.f32 %v329_v34, %v175_v63  ;;  %v3550_v41 = vadd.f32 %v309_v59, %v191_v21  ;;  %v161_v63 = vadd.f32 %v160_v45, %v62_v50 }
  0xe3   :  { %v196_v42 = vpop.f32.mrf.mxu0  ;;  %v333_v43 = vpop.f32.mrf.mxu1 }
  0xe4   :  { %v197_v44 = vadd.f32 %v196_v42, %v62_v50  ;;  %v3552_v47 = vadd.f32 %v333_v43, %v167_v54  ;;  %v3554_v51 = vadd.f32 %v311_v62, %v193_v37 }
  0xe5   :  { %v198_v55 = vpop.f32.mrf.mxu0  ;;  %v335_v58 = vpop.f32.mrf.mxu1 }
  0xe6   :  { %v199_v60 = vadd.f32 %v198_v55, %v66_v53  ;;  %v3556_v61 = vadd.f32 %v335_v58, %v169_v57  ;;  %v3558_v0 = vadd.f32 %v303_v52, %v197_v44  ;;  %v163_v52 = vadd.f32 %v3536_v48, %v66_v53 }
  0xe7   :  { %v202_v1 = vpop.f32.mrf.mxu0  ;;  %v339_v2 = vpop.f32.mrf.mxu1 }
  0xe8   :  { %v203_v4 = vadd.f32 %v202_v1, %v62_v50  ;;  %v3560_v59 = vadd.f32 %v305_v56, %v199_v60  ;;  %v380_v6 = vadd.f32 %v339_v2, %v161_v63 }
  0xe9   :  { %v204_v5 = vpop.f32.mrf.mxu0  ;;  %v341_v57 = vpop.f32.mrf.mxu1 }
  0xea   :  { %v205_v7 = vadd.f32 %v204_v5, %v66_v53  ;;  %v3562_v54 = vadd.f32 %v297_v46, %v203_v4  ;;  %v381_v13 = vadd.f32 %v341_v57, %v163_v52 }
  0xeb   :  { %v452_v62 = vpop.f32.mrf.mxu0 }
  0xec   :  { %v457_v8 = vadd.f32 %v452_v62, %v380_v6  ;;  %v3564_v9 = vadd.f32 %v299_v49, %v205_v7 }
  0xed   :  { %v454_v12 = vpop.f32.mrf.mxu0 }
  0xee   :  { %v2734_v11 = vmul.f32 -1.442695, %v457_v8  ;;  %v458_v45 = vadd.f32 %v454_v12, %v381_v13 }
  0xf0   :  { %3057 = vpow2.f32 %v2734_v11  ;;  %v2735_v49 = vmul.f32 -1.442695, %v458_v45 }
  0xf1   :  { %3059 = vtanh.f32 %v458_v45 }
  0xfd   :  { %v3058_v50 = vpop.eup %3057 }
  0xfe   :  { %v462_v56 = vadd.f32 1.0, %v3058_v50  ;;  %v3060_v16 = vpop.eup %3059 }
 0x100   :  { %3061 = vrcp.f32 %v462_v56 }
 0x101   :  { %3063 = vpow2.f32 %v2735_v49 }
 0x10d   :  { %v3062_v17 = vpop.eup %3061 }
 0x10e   :  { %v473_v46 = vmul.f32 %v3062_v17, %v3060_v16  ;;  %v3064_v21 = vpop.eup %3063  ;;  %v472_v34 = vmul.f32 0.0, %v3062_v17 }
 0x10f   :  { %v469_v31 = vadd.f32 1.0, %v3064_v21 }
 0x110   :  { %475 = vrot.lane.b32.xlu0 %v473_v46, %s3226_s3 }
 0x111   :  { %3065 = vrcp.f32 %v469_v31 }
 0x11e   :  { %v3066_v53 = vpop.eup %3065 }
 0x182   :  { %v476_v37 = vpop.permute.xlu0 %475 }
 0x183   :  { %v478_v48 = vadd.f32 %v476_v37, %v472_v34 }
 0x185   :  { %3067 = vtanh.f32 %v478_v48 }
 0x192   :  { %v3068_v42 = vpop.eup %3067 }
 0x193   :  { %v3568_v43 = vmul.f32 %v3068_v42, %v3066_v53 }
 0x195   :  { %482 = vrot.lane.b32.xlu0 %v3568_v43, %s3226_s3 }
 0x207   :  { %v483_v44 = vpop.permute.xlu0 %482 }
 0x208   :  { %485 = vst.msk [vmem:[#allocation4] sm:$0xff] %vm69_vm0, %v483_v44  ;;  %2736 = vmatmul.mubr.msk.f32.vlgmr.msra.gmra.mxu1 %vm382_vm1, %v483_v44 }
 0x209   :  { %739 = vmatpush1.msra.mxu1 %v3356_v19  ;;  %786 = vmatprep.mubr.f32.mxu1 %v3225_v3 }
 0x20a   :  { %740 = vmatprep.subr.mxu1 %v3363_v20 }
 0x20b   :  { %741 = vmatpush1.msra.mxu1 %v3375_v22 }
 0x20c   :  { %742 = vmatprep.subr.mxu1 %v3381_v23 }
 0x20d   :  { %743 = vmatpush1.msra.mxu1 %v3389_v24 }
 0x20e   :  { %744 = vmatprep.subr.mxu1 %v3402_v26 }
 0x20f   :  { %745 = vmatpush1.msra.mxu1 %v3410_v27 }
 0x210   :  { %746 = vmatprep.subr.mxu1 %v3423_v29 }
 0x211   :  { %747 = vmatpush1.msra.mxu1 %v3431_v30 }
 0x212   :  { %748 = vmatprep.subr.mxu1 %v3444_v32 }
 0x213   :  { %749 = vmatpush1.msra.mxu1 %v3452_v33 }
 0x214   :  { %750 = vmatprep.subr.mxu1 %v3465_v35 }
 0x215   :  { %751 = vmatpush1.msra.mxu1 %v3473_v36 }
 0x216   :  { %752 = vmatprep.subr.mxu1 %v3486_v38 }
 0x217   :  { %753 = vmatpush1.msra.mxu1 %v3494_v39 }
 0x218   :  { %962 = vmatprep.subr.mxu1 %v3351_v18 }
 0x2c8   :  { %v564_v55 = vpop.f32.mrf.mxu1 }
 0x2c9   :  { %v569_v58 = vadd.f32 %v564_v55, %v3552_v47 }
 0x2ca   :  { %v566_v1 = vpop.f32.mrf.mxu1 }
 0x2cb   :  { %v2737_v60 = vmul.f32 -1.442695, %v569_v58  ;;  %v570_v2 = vadd.f32 %v566_v1, %v3556_v61 }
 0x2cd   :  { %3069 = vpow2.f32 %v2737_v60  ;;  %v2738_v62 = vmul.f32 -1.442695, %v570_v2 }
 0x2ce   :  { %3071 = vtanh.f32 %v570_v2 }
 0x2da   :  { %v3070_v63 = vpop.eup %3069 }
 0x2db   :  { %v574_v4 = vadd.f32 1.0, %v3070_v63  ;;  %v3072_v5 = vpop.eup %3071 }
 0x2dd   :  { %3073 = vrcp.f32 %v574_v4 }
 0x2de   :  { %3075 = vpow2.f32 %v2738_v62 }
 0x2ea   :  { %v3074_v6 = vpop.eup %3073 }
 0x2eb   :  { %v585_v7 = vmul.f32 %v3074_v6, %v3072_v5  ;;  %v3076_v8 = vpop.eup %3075  ;;  %v584_v57 = vmul.f32 %v3074_v6, %v478_v48 }
 0x2ec   :  { %v581_v11 = vadd.f32 1.0, %v3076_v8 }
 0x2ed   :  { %587 = vrot.lane.b32.xlu1 %v585_v7, %s3226_s3 }
 0x2ee   :  { %3077 = vrcp.f32 %v581_v11 }
 0x2fb   :  { %v3078_v12 = vpop.eup %3077 }
 0x35f   :  { %v588_v47 = vpop.permute.xlu1 %587 }
 0x360   :  { %v590_v52 = vadd.f32 %v588_v47, %v584_v57 }
 0x362   :  { %3079 = vtanh.f32 %v590_v52 }
 0x36f   :  { %v3080_v61 = vpop.eup %3079 }
 0x370   :  { %v3594_v13 = vmul.f32 %v3080_v61, %v3078_v12 }
 0x372   :  { %594 = vrot.lane.b32.xlu1 %v3594_v13, %s3226_s3 }
 0x3e4   :  { %v595_v45 = vpop.permute.xlu1 %594 }
 0x3e5   :  { %597 = vst.msk [vmem:[#allocation4 + $0x8] sm:$0xff] %vm69_vm0, %v595_v45  ;;  %2739 = vmatmul.mubr.msk.f32.vlgmr.msra.gmra.mxu0 %vm382_vm1, %v595_v45 }
 0x3e6   :  { %851 = vmatpush1.msra.mxu0 %v3356_v19  ;;  %898 = vmatprep.mubr.f32.mxu0 %v3225_v3 }
 0x3e7   :  { %852 = vmatprep.subr.mxu0 %v3363_v20 }
 0x3e8   :  { %853 = vmatpush1.msra.mxu0 %v3375_v22 }
 0x3e9   :  { %854 = vmatprep.subr.mxu0 %v3381_v23 }
 0x3ea   :  { %855 = vmatpush1.msra.mxu0 %v3389_v24 }
 0x3eb   :  { %856 = vmatprep.subr.mxu0 %v3402_v26 }
 0x3ec   :  { %857 = vmatpush1.msra.mxu0 %v3410_v27 }
 0x3ed   :  { %858 = vmatprep.subr.mxu0 %v3423_v29 }
 0x3ee   :  { %859 = vmatpush1.msra.mxu0 %v3431_v30 }
 0x3ef   :  { %860 = vmatprep.subr.mxu0 %v3444_v32 }
 0x3f0   :  { %861 = vmatpush1.msra.mxu0 %v3452_v33 }
 0x3f1   :  { %862 = vmatprep.subr.mxu0 %v3465_v35 }
 0x3f2   :  { %863 = vmatpush1.msra.mxu0 %v3473_v36 }
 0x3f3   :  { %864 = vmatprep.subr.mxu0 %v3486_v38 }
 0x3f4   :  { %865 = vmatpush1.msra.mxu0 %v3494_v39 }
 0x3f5   :  { %1074 = vmatprep.subr.mxu0 %v3351_v18 }
 0x4a5   :  { %v676_v50 = vpop.f32.mrf.mxu0 }
 0x4a6   :  { %v681_v56 = vadd.f32 %v676_v50, %v3544_v25 }
 0x4a7   :  { %v678_v17 = vpop.f32.mrf.mxu0 }
 0x4a8   :  { %v2740_v16 = vmul.f32 -1.442695, %v681_v56  ;;  %v682_v46 = vadd.f32 %v678_v17, %v3548_v40 }
 0x4aa   :  { %3081 = vpow2.f32 %v2740_v16  ;;  %v2741_v48 = vmul.f32 -1.442695, %v682_v46 }
 0x4ab   :  { %3083 = vtanh.f32 %v682_v46 }
 0x4b7   :  { %v3082_v49 = vpop.eup %3081 }
 0x4b8   :  { %v686_v21 = vadd.f32 1.0, %v3082_v49  ;;  %v3084_v31 = vpop.eup %3083 }
 0x4ba   :  { %3085 = vrcp.f32 %v686_v21 }
 0x4bb   :  { %3087 = vpow2.f32 %v2741_v48 }
 0x4c7   :  { %v3086_v34 = vpop.eup %3085 }
 0x4c8   :  { %v697_v37 = vmul.f32 %v3086_v34, %v3084_v31  ;;  %v3088_v53 = vpop.eup %3087  ;;  %v696_v44 = vmul.f32 %v3086_v34, %v590_v52 }
 0x4c9   :  { %v693_v42 = vadd.f32 1.0, %v3088_v53 }
 0x4ca   :  { %699 = vrot.lane.b32.xlu0 %v697_v37, %s3226_s3 }
 0x4cb   :  { %3089 = vrcp.f32 %v693_v42 }
 0x4d8   :  { %v3090_v58 = vpop.eup %3089 }
 0x53c   :  { %v700_v25 = vpop.permute.xlu0 %699 }
 0x53d   :  { %v702_v55 = vadd.f32 %v700_v25, %v696_v44 }
 0x53f   :  { %3091 = vtanh.f32 %v702_v55 }
 0x54c   :  { %v3092_v40 = vpop.eup %3091 }
 0x54d   :  { %v3620_v60 = vmul.f32 %v3092_v40, %v3090_v58 }
 0x54f   :  { %706 = vrot.lane.b32.xlu1 %v3620_v60, %s3226_s3 }
 0x5c1   :  { %v707_v1 = vpop.permute.xlu1 %706 }
 0x5c2   :  { %709 = vst.msk [vmem:[#allocation4 + $0x10] sm:$0xff] %vm69_vm0, %v707_v1  ;;  %2742 = vmatmul.mubr.msk.f32.vlgmr.msra.gmra.mxu1 %vm382_vm1, %v707_v1 }
 0x5c3   :  { %963 = vmatpush1.msra.mxu1 %v3356_v19  ;;  %1010 = vmatprep.mubr.f32.mxu1 %v3225_v3 }
 0x5c4   :  { %964 = vmatprep.subr.mxu1 %v3363_v20 }
 0x5c5   :  { %965 = vmatpush1.msra.mxu1 %v3375_v22 }
 0x5c6   :  { %966 = vmatprep.subr.mxu1 %v3381_v23 }
 0x5c7   :  { %967 = vmatpush1.msra.mxu1 %v3389_v24 }
 0x5c8   :  { %968 = vmatprep.subr.mxu1 %v3402_v26 }
 0x5c9   :  { %969 = vmatpush1.msra.mxu1 %v3410_v27 }
 0x5ca   :  { %970 = vmatprep.subr.mxu1 %v3423_v29 }
 0x5cb   :  { %971 = vmatpush1.msra.mxu1 %v3431_v30 }
 0x5cc   :  { %972 = vmatprep.subr.mxu1 %v3444_v32 }
 0x5cd   :  { %973 = vmatpush1.msra.mxu1 %v3452_v33 }
 0x5ce   :  { %974 = vmatprep.subr.mxu1 %v3465_v35 }
 0x5cf   :  { %975 = vmatpush1.msra.mxu1 %v3473_v36 }
 0x5d0   :  { %976 = vmatprep.subr.mxu1 %v3486_v38 }
 0x5d1   :  { %977 = vmatpush1.msra.mxu1 %v3494_v39 }
 0x5d2   :  { %1186 = vmatprep.subr.mxu1 %v3351_v18 }
 0x682   :  { %v788_v2 = vpop.f32.mrf.mxu1 }
 0x683   :  { %v793_v63 = vadd.f32 %v788_v2, %v3538_v10 }
 0x684   :  { %v790_v5 = vpop.f32.mrf.mxu1 }
 0x685   :  { %v2743_v4 = vmul.f32 -1.442695, %v793_v63  ;;  %v794_v6 = vadd.f32 %v790_v5, %v3540_v14 }
 0x687   :  { %3093 = vpow2.f32 %v2743_v4  ;;  %v2744_v47 = vmul.f32 -1.442695, %v794_v6 }
 0x688   :  { %3095 = vtanh.f32 %v794_v6 }
 0x694   :  { %v3094_v7 = vpop.eup %3093 }
 0x695   :  { %v798_v62 = vadd.f32 1.0, %v3094_v7  ;;  %v3096_v8 = vpop.eup %3095 }
 0x697   :  { %3097 = vrcp.f32 %v798_v62 }
 0x698   :  { %3099 = vpow2.f32 %v2744_v47 }
 0x6a4   :  { %v3098_v11 = vpop.eup %3097 }
 0x6a5   :  { %v809_v57 = vmul.f32 %v3098_v11, %v3096_v8  ;;  %v3100_v18 = vpop.eup %3099  ;;  %v808_v12 = vmul.f32 %v3098_v11, %v702_v55 }
 0x6a6   :  { %v805_v52 = vadd.f32 1.0, %v3100_v18 }
 0x6a7   :  { %811 = vrot.lane.b32.xlu0 %v809_v57, %s3226_s3 }
 0x6a8   :  { %3101 = vrcp.f32 %v805_v52 }
 0x6b5   :  { %v3102_v45 = vpop.eup %3101 }
 0x719   :  { %v812_v10 = vpop.permute.xlu0 %811 }
 0x71a   :  { %v814_v61 = vadd.f32 %v812_v10, %v808_v12  ;;  %v1293_v10 = vld [vmem:[%s4069_s5 + $0x18] sm:$0xff] }
 0x71c   :  { %3103 = vtanh.f32 %v814_v61 }
 0x729   :  { %v3104_v14 = vpop.eup %3103 }
 0x72a   :  { %v3646_v50 = vmul.f32 %v3104_v14, %v3102_v45 }
 0x72c   :  { %818 = vrot.lane.b32.xlu1 %v3646_v50, %s3226_s3 }
 0x79e   :  { %v819_v56 = vpop.permute.xlu1 %818 }
 0x79f   :  { %821 = vst.msk [vmem:[#allocation4 + $0x18] sm:$0xff] %vm69_vm0, %v819_v56  ;;  %2745 = vmatmul.mubr.msk.f32.vlgmr.msra.gmra.mxu0 %vm382_vm1, %v819_v56 }
 0x7a0   :  { %1075 = vmatpush1.msra.mxu0 %v3356_v19  ;;  %1122 = vmatprep.mubr.f32.mxu0 %v3225_v3 }
 0x7a1   :  { %1076 = vmatprep.subr.mxu0 %v3363_v20 }
 0x7a2   :  { %1077 = vmatpush1.msra.mxu0 %v3375_v22 }
 0x7a3   :  { %1078 = vmatprep.subr.mxu0 %v3381_v23 }
 0x7a4   :  { %1079 = vmatpush1.msra.mxu0 %v3389_v24 }
 0x7a5   :  { %1080 = vmatprep.subr.mxu0 %v3402_v26 }
 0x7a6   :  { %1081 = vmatpush1.msra.mxu0 %v3410_v27 }
 0x7a7   :  { %1082 = vmatprep.subr.mxu0 %v3423_v29 }
 0x7a8   :  { %1083 = vmatpush1.msra.mxu0 %v3431_v30 }
 0x7a9   :  { %1084 = vmatprep.subr.mxu0 %v3444_v32 }
 0x7aa   :  { %1085 = vmatpush1.msra.mxu0 %v3452_v33 }
 0x7ab   :  { %1086 = vmatprep.subr.mxu0 %v3465_v35 }
 0x7ac   :  { %1087 = vmatpush1.msra.mxu0 %v3473_v36 }
 0x7ad   :  { %1088 = vmatprep.subr.mxu0 %v3486_v38 }
 0x7ae   :  { %1089 = vmatpush1.msra.mxu0 %v3494_v39 }
 0x85f   :  { %v900_v16 = vpop.f32.mrf.mxu0 }
 0x860   :  { %v905_v17 = vadd.f32 %v900_v16, %v3542_v15 }
 0x861   :  { %v902_v49 = vpop.f32.mrf.mxu0 }
 0x862   :  { %v2746_v46 = vmul.f32 -1.442695, %v905_v17  ;;  %v906_v21 = vadd.f32 %v902_v49, %v3546_v28 }
 0x864   :  { %3105 = vpow2.f32 %v2746_v46  ;;  %v2747_v42 = vmul.f32 -1.442695, %v906_v21 }
 0x865   :  { %3107 = vtanh.f32 %v906_v21  ;;  %v1292_v21 = vld [vmem:[%s4069_s5 + $0x10] sm:$0xff] }
 0x871   :  { %v3106_v31 = vpop.eup %3105 }
 0x872   :  { %v910_v34 = vadd.f32 1.0, %v3106_v31  ;;  %v3108_v37 = vpop.eup %3107  ;;  %v1274_v31 = vld [vmem:[#allocation4] sm:$0xff] }
 0x874   :  { %3109 = vrcp.f32 %v910_v34  ;;  %v1291_v34 = vld [vmem:[%s4069_s5 + $0x8] sm:$0xff] }
 0x875   :  { %3111 = vpow2.f32 %v2747_v42  ;;  %v1277_v42 = vld [vmem:[#allocation4 + $0x18] sm:$0xff] }
 0x881   :  { %v3110_v48 = vpop.eup %3109 }
 0x882   :  { %v921_v53 = vmul.f32 %v3110_v48, %v3108_v37  ;;  %v3112_v44 = vpop.eup %3111  ;;  %v920_v55 = vmul.f32 %v3110_v48, %v814_v61  ;;  %v1290_v37 = vld [vmem:[%s4069_s5] sm:$0xff]  ;;  %v1275_v48 = vld [vmem:[#allocation4 + $0x8] sm:$0xff] }
 0x883   :  { %v917_v25 = vadd.f32 1.0, %v3112_v44 }
 0x884   :  { %923 = vrot.lane.b32.xlu0 %v921_v53, %s3226_s3  ;;  %v1276_v53 = vld [vmem:[#allocation4 + $0x10] sm:$0xff] }
 0x885   :  { %3113 = vrcp.f32 %v917_v25 }
 0x892   :  { %v3114_v40 = vpop.eup %3113 }
 0x8f6   :  { %v924_v15 = vpop.permute.xlu0 %923 }
 0x8f7   :  { %v926_v58 = vadd.f32 %v924_v15, %v920_v55 }
 0x8f9   :  { %3115 = vtanh.f32 %v926_v58 }
 0x906   :  { %v3116_v28 = vpop.eup %3115 }
 0x907   :  { %v3671_v1 = vmul.f32 %v3116_v28, %v3114_v40 }
 0x909   :  { %930 = vrot.lane.b32.xlu1 %v3671_v1, %s3226_s3 }
 0x97b   :  { %v931_v2 = vpop.permute.xlu1 %930 }
 0x97c   :  { %933 = vst.msk [vmem:[#allocation4 + $0x20] sm:$0xff] %vm69_vm0, %v931_v2  ;;  %2748 = vmatmul.mubr.msk.f32.vlgmr.msra.gmra.mxu1 %vm382_vm1, %v931_v2 }
 0x97d   :  { %1187 = vmatpush1.msra.mxu1 %v3356_v19  ;;  %1234 = vmatprep.mubr.f32.mxu1 %v3225_v3 }
 0x97e   :  { %1188 = vmatprep.subr.mxu1 %v3363_v20 }
 0x97f   :  { %1189 = vmatpush1.msra.mxu1 %v3375_v22 }
 0x980   :  { %1190 = vmatprep.subr.mxu1 %v3381_v23 }
 0x981   :  { %1191 = vmatpush1.msra.mxu1 %v3389_v24 }
 0x982   :  { %1192 = vmatprep.subr.mxu1 %v3402_v26 }
 0x983   :  { %1193 = vmatpush1.msra.mxu1 %v3410_v27  ;;  %v1278_v44 = vld [vmem:[#allocation4 + $0x20] sm:$0xff] }
 0x984   :  { %1194 = vmatprep.subr.mxu1 %v3423_v29 }
 0x985   :  { %1195 = vmatpush1.msra.mxu1 %v3431_v30 }
 0x986   :  { %1196 = vmatprep.subr.mxu1 %v3444_v32 }
 0x987   :  { %1197 = vmatpush1.msra.mxu1 %v3452_v33 }
 0x988   :  { %1198 = vmatprep.subr.mxu1 %v3465_v35 }
 0x989   :  { %1199 = vmatpush1.msra.mxu1 %v3473_v36 }
 0x98a   :  { %1200 = vmatprep.subr.mxu1 %v3486_v38 }
 0x98b   :  { %1201 = vmatpush1.msra.mxu1 %v3494_v39 }
 0x98c   :  { %2900 = vmatprep.subr.mxu1 %v1293_v10 }
 0xa3c   :  { %v1012_v19 = vpop.f32.mrf.mxu1 }
 0xa3d   :  { %v1017_v20 = vadd.f32 %v1012_v19, %v3550_v41 }
 0xa3e   :  { %v1014_v23 = vpop.f32.mrf.mxu1 }
 0xa3f   :  { %v2749_v22 = vmul.f32 -1.442695, %v1017_v20  ;;  %v1018_v24 = vadd.f32 %v1014_v23, %v3554_v51 }
 0xa41   :  { %3117 = vpow2.f32 %v2749_v22  ;;  %v2750_v33 = vmul.f32 -1.442695, %v1018_v24 }
 0xa42   :  { %3119 = vtanh.f32 %v1018_v24 }
 0xa4e   :  { %v3118_v26 = vpop.eup %3117 }
 0xa4f   :  { %v1022_v27 = vadd.f32 1.0, %v3118_v26  ;;  %v3120_v29 = vpop.eup %3119 }
 0xa51   :  { %3121 = vrcp.f32 %v1022_v27 }
 0xa52   :  { %3123 = vpow2.f32 %v2750_v33  ;;  %v1295_v33 = vld [vmem:[%s4069_s5 + $0x28] sm:$0xff] }
 0xa5e   :  { %v3122_v30 = vpop.eup %3121 }
 0xa5f   :  { %v1033_v32 = vmul.f32 %v3122_v30, %v3120_v29  ;;  %v3124_v35 = vpop.eup %3123  ;;  %v1032_v38 = vmul.f32 %v3122_v30, %v926_v58 }
 0xa60   :  { %v1029_v36 = vadd.f32 1.0, %v3124_v35  ;;  %v1294_v35 = vld [vmem:[%s4069_s5 + $0x20] sm:$0xff] }
 0xa61   :  { %1035 = vrot.lane.b32.xlu0 %v1033_v32, %s3226_s3 }
 0xa62   :  { %3125 = vrcp.f32 %v1029_v36 }
 0xa6f   :  { %v3126_v63 = vpop.eup %3125 }
 0xad3   :  { %v1036_v39 = vpop.permute.xlu0 %1035 }
 0xad4   :  { %v1038_v41 = vadd.f32 %v1036_v39, %v1032_v38 }
 0xad6   :  { %3127 = vtanh.f32 %v1038_v41 }
 0xae3   :  { %v3128_v51 = vpop.eup %3127 }
 0xae4   :  { %v3696_v4 = vmul.f32 %v3128_v51, %v3126_v63 }
 0xae6   :  { %1042 = vrot.lane.b32.xlu1 %v3696_v4, %s3226_s3 }
 0xb58   :  { %v1043_v5 = vpop.permute.xlu1 %1042 }
 0xb59   :  { %1045 = vst.msk [vmem:[#allocation4 + $0x28] sm:$0xff] %vm69_vm0, %v1043_v5  ;;  %2751 = vmatmul.mubr.msk.f32.vlgmr.msra.gmra.mxu0 %vm382_vm1, %v1043_v5 }
 0xb60   :  { %v1279_v25 = vld [vmem:[#allocation4 + $0x28] sm:$0xff] }
 0xc19   :  { %v1124_v6 = vpop.f32.mrf.mxu0 }
 0xc1a   :  { %v1129_v7 = vadd.f32 %v1124_v6, %v3558_v0 }
 0xc1b   :  { %v1126_v8 = vpop.f32.mrf.mxu0 }
 0xc1c   :  { %v2752_v62 = vmul.f32 -1.442695, %v1129_v7  ;;  %v1130_v11 = vadd.f32 %v1126_v8, %v3560_v59 }
 0xc1e   :  { %3129 = vpow2.f32 %v2752_v62  ;;  %v2753_v0 = vmul.f32 -1.442695, %v1130_v11  ;;  %v1305_v62 = vld [vmem:[%s4070_s8 + $0x38] sm:$0xff] }
 0xc1f   :  { %3131 = vtanh.f32 %v1130_v11  ;;  %v1303_v11 = vld [vmem:[%s4070_s8 + $0x28] sm:$0xff] }
 0xc2b   :  { %v3130_v57 = vpop.eup %3129 }
 0xc2c   :  { %v1134_v47 = vadd.f32 1.0, %v3130_v57  ;;  %v3132_v18 = vpop.eup %3131 }
 0xc2e   :  { %3133 = vrcp.f32 %v1134_v47  ;;  %v1302_v47 = vld [vmem:[%s4070_s8 + $0x20] sm:$0xff] }
 0xc2f   :  { %3135 = vpow2.f32 %v2753_v0  ;;  %v3798_v0 = vld [vmem:[%s4071_s6 + $0x18] sm:$0xff] }
 0xc3b   :  { %v3134_v52 = vpop.eup %3133 }
 0xc3c   :  { %v1145_v12 = vmul.f32 %v3134_v52, %v3132_v18  ;;  %v3136_v61 = vpop.eup %3135  ;;  %v1144_v14 = vmul.f32 %v3134_v52, %v1038_v41 }
 0xc3d   :  { %v1141_v45 = vadd.f32 1.0, %v3136_v61  ;;  %v3804_v61 = vld [vmem:[%s4071_s6 + $0x10] sm:$0xff] }
 0xc3e   :  { %1147 = vrot.lane.b32.xlu0 %v1145_v12, %s3226_s3 }
 0xc3f   :  { %3137 = vrcp.f32 %v1141_v45  ;;  %v3813_v45 = vld [vmem:[%s4071_s6 + $0x8] sm:$0xff] }
 0xc4c   :  { %v3138_v16 = vpop.eup %3137 }
 0xcb0   :  { %v1148_v59 = vpop.permute.xlu0 %1147 }
 0xcb1   :  { %v1150_v56 = vadd.f32 %v1148_v59, %v1144_v14  ;;  %v3820_v14 = vld [vmem:[%s4071_s6] sm:$0xff] }
 0xcb3   :  { %3139 = vtanh.f32 %v1150_v56 }
 0xcc0   :  { %v3140_v17 = vpop.eup %3139 }
 0xcc1   :  { %v1152_v46 = vmul.f32 %v3140_v17, %v3138_v16 }
 0xcc3   :  { %1154 = vrot.lane.b32.xlu1 %v1152_v46, %s3226_s3 }
 0xd35   :  { %v1155_v49 = vpop.permute.xlu1 %1154 }
 0xd36   :  { %1157 = vst.msk [vmem:[#allocation4 + $0x30] sm:$0xff] %vm69_vm0, %v1155_v49  ;;  %2754 = vmatmul.mubr.msk.f32.vlgmr.msra.gmra.mxu1 %vm382_vm1, %v1155_v49 }
 0xd37   :  { %2901 = vmatpush3.msra.mxu1 %v1293_v10  ;;  %2908 = vmatprep.mubr.msk.f32.mxu1 %vm69_vm0, %v1274_v31 }
 0xd38   :  { %2902 = vmatprep.subr.mxu1 %v1292_v21 }
 0xd39   :  { %2903 = vmatpush3.msra.mxu1 %v1292_v21 }
 0xd3a   :  { %2904 = vmatprep.subr.mxu1 %v1291_v34 }
 0xd3b   :  { %2905 = vmatpush3.msra.mxu1 %v1291_v34 }
 0xd3c   :  { %2906 = vmatprep.subr.mxu1 %v1290_v37 }
 0xd3d   :  { %2907 = vmatpush3.msra.mxu1 %v1290_v37  ;;  %v1280_v55 = vld [vmem:[#allocation4 + $0x30] sm:$0xff] }
 0xd3e   :  { %2909 = vmatmul.mubr.msk.f32.vlgmr.msra.gmra.mxu1 %vm69_vm0, %v1275_v48  ;;  %2931 = vmatprep.subr.mxu1 %v3225_v3 }
 0xd3f   :  { %2911 = vmatprep.mubr.msk.f32.mxu1 %vm69_vm0, %v1276_v53 }
 0xd42   :  { %2912 = vmatmul.mubr.msk.f32.gmra.mxu1 %vm69_vm0, %v1277_v42 }
 0xd43   :  { %2914 = vmatprep.mubr.msk.f32.mxu1 %vm69_vm0, %v1278_v44  ;;  %v3858_v44 = vld [vmem:[%s4072_s7] ss:$0 sm:$0xff] }
 0xd46   :  { %2915 = vmatmul.mubr.msk.f32.gmra.mxu1 %vm69_vm0, %v1279_v25 }
 0xd47   :  { %2917 = vmatprep.mubr.msk.f32.mxu1 %vm69_vm0, %v1280_v55 }
 0xdf6   :  { %v1236_v15 = vpop.f32.mrf.mxu1 }
 0xdf7   :  { %v1241_v58 = vadd.f32 %v1236_v15, %v3562_v54 }
 0xdf8   :  { %v1238_v28 = vpop.f32.mrf.mxu1 }
 0xdf9   :  { %v2755_v40 = vmul.f32 -1.442695, %v1241_v58  ;;  %v1242_v2 = vadd.f32 %v1238_v28, %v3564_v9 }
 0xdfb   :  { %3141 = vpow2.f32 %v2755_v40  ;;  %v2756_v54 = vmul.f32 -1.442695, %v1242_v2 }
 0xdfc   :  { %3143 = vtanh.f32 %v1242_v2 }
 0xdfe   :  { %v3849_v31 = vpop.f32.mrf.mxu1 }
 0xe00   :  { %v1525_v48 = vpop.f32.mrf.mxu1 }
 0xe08   :  { %v3142_v19 = vpop.eup %3141 }
 0xe09   :  { %v1246_v20 = vadd.f32 1.0, %v3142_v19  ;;  %v3144_v22 = vpop.eup %3143 }
 0xe0b   :  { %3145 = vrcp.f32 %v1246_v20  ;;  %v1301_v20 = vld [vmem:[%s4070_s8 + $0x18] sm:$0xff] }
 0xe0c   :  { %3147 = vpow2.f32 %v2756_v54  ;;  %2932 = vmatpush3.msra.mxu1 %v1301_v20 }
 0xe0d   :  { %2933 = vmatprep.subr.mxu1 %v3225_v3 }
 0xe18   :  { %v3146_v23 = vpop.eup %3145 }
 0xe19   :  { %v1257_v24 = vmul.f32 %v3146_v23, %v3144_v22  ;;  %v3148_v9 = vpop.eup %3147  ;;  %v1256_v27 = vmul.f32 %v3146_v23, %v1150_v56  ;;  %v1300_v22 = vld [vmem:[%s4070_s8 + $0x10] sm:$0xff] }
 0xe1a   :  { %v1253_v26 = vadd.f32 1.0, %v3148_v9  ;;  %2934 = vmatpush3.msra.mxu1 %v1300_v22  ;;  %v1299_v9 = vld [vmem:[%s4070_s8 + $0x8] sm:$0xff] }
 0xe1b   :  { %1259 = vrot.lane.b32.xlu0 %v1257_v24, %s3226_s3  ;;  %2935 = vmatprep.subr.mxu1 %v3225_v3 }
 0xe1c   :  { %3149 = vrcp.f32 %v1253_v26  ;;  %v1298_v26 = vld [vmem:[%s4070_s8] sm:$0xff]  ;;  %2936 = vmatpush3.msra.mxu1 %v1299_v9 }
 0xe1d   :  { %2937 = vmatprep.subr.mxu1 %v3225_v3 }
 0xe1e   :  { %2938 = vmatpush3.msra.mxu1 %v1298_v26 }
 0xe1f   :  { %1158 = vrot.lane.b32.xlu0 %v1152_v46, %s3227_s13  ;;  %2953 = vmatprep.subr.mxu1 %v3225_v3 }
 0xe23   :  { %934 = vrot.lane.b32.xlu0 %v3671_v1, %s3227_s13  ;;  %v1297_v1 = vld [vmem:[%s4069_s5 + $0x38] sm:$0xff] }
 0xe24   :  { %2880 = vmatprep.subr.mxu0 %v1297_v1 }
 0xe25   :  { %2881 = vmatpush3.msra.mxu0 %v1297_v1 }
 0xe27   :  { %710 = vrot.lane.b32.xlu0 %v3620_v60, %s3227_s13 }
 0xe29   :  { %v3150_v38 = vpop.eup %3149 }
 0xe2b   :  { %486 = vrot.lane.b32.xlu0 %v3568_v43, %s3227_s13  ;;  %v1296_v43 = vld [vmem:[%s4069_s5 + $0x30] sm:$0xff] }
 0xe2c   :  { %2882 = vmatprep.subr.mxu0 %v1296_v43 }
 0xe2d   :  { %2883 = vmatpush3.msra.mxu0 %v1296_v43 }
 0xe2e   :  { %2884 = vmatprep.subr.mxu0 %v1295_v33 }
 0xe2f   :  { %2885 = vmatpush3.msra.mxu0 %v1295_v33 }
 0xe30   :  { %2886 = vmatprep.subr.mxu0 %v1294_v35 }
 0xe31   :  { %2887 = vmatpush3.msra.mxu0 %v1294_v35  ;;  %v3898_v35 = vpop.f32.mrf.mxu1 }
 0xe32   :  { %2920 = vmatprep.subr.mxu0 %v3225_v3 }
 0xe8d   :  { %v1260_v29 = vpop.permute.xlu0 %1259 }
 0xe8e   :  { %v1262_v30 = vadd.f32 %v1260_v29, %v1256_v27 }
 0xe90   :  { %3151 = vtanh.f32 %v1262_v30 }
 0xe91   :  { %v1159_v32 = vpop.permute.xlu0 %1158 }
 0xe92   :  { %1161 = vst.msk [vmem:[#allocation5 + $0x8] sm:$0xff] %vm69_vm0, %v1159_v32 }
 0xe95   :  { %v935_v60 = vpop.permute.xlu0 %934 }
 0xe96   :  { %937 = vst.msk [vmem:[#allocation5 + $0x18] sm:$0xff] %vm69_vm0, %v935_v60 }
 0xe99   :  { %v711_v36 = vpop.permute.xlu0 %710 }
 0xe9a   :  { %713 = vst.msk [vmem:[#allocation5 + $0x28] sm:$0xff] %vm69_vm0, %v711_v36  ;;  %v1535_v36 = vpop.f32.mrf.mxu1 }
 0xe9d   :  { %v3152_v39 = vpop.eup %3151  ;;  %v487_v41 = vpop.permute.xlu0 %486  ;;  %v1285_v57 = vld [vmem:[#allocation5 + $0x18] sm:$0xff] }
 0xe9e   :  { %489 = vst.msk [vmem:[#allocation5 + $0x38] sm:$0xff] %vm69_vm0, %v487_v41  ;;  %v3755_v63 = vmul.f32 %v3152_v39, %v3150_v38  ;;  %v3900_v38 = vpop.f32.mrf.mxu1 }
 0xea0   :  { %1270 = vrot.lane.b32.xlu1 %v3755_v63, %s3227_s13  ;;  %v3902_v39 = vpop.f32.mrf.mxu1 }
 0xea1   :  { %v1287_v52 = vld [vmem:[#allocation5 + $0x28] sm:$0xff] }
 0xea4   :  { %1046 = vrot.lane.b32.xlu1 %v3696_v4, %s3227_s13 }
 0xea5   :  { %v1289_v10 = vld [vmem:[#allocation5 + $0x38] sm:$0xff] }
 0xea8   :  { %822 = vrot.lane.b32.xlu1 %v3646_v50, %s3227_s13  ;;  %v1283_v50 = vld [vmem:[#allocation5 + $0x8] sm:$0xff] }
 0xeac   :  { %598 = vrot.lane.b32.xlu1 %v3594_v13, %s3227_s13  ;;  %v1304_v13 = vld [vmem:[%s4070_s8 + $0x30] sm:$0xff] }
 0xf12   :  { %v1271_v51 = vpop.permute.xlu1 %1270 }
 0xf13   :  { %1273 = vst.msk [vmem:[#allocation5] sm:$0xff] %vm69_vm0, %v1271_v51 }
 0xf16   :  { %v1047_v5 = vpop.permute.xlu1 %1046 }
 0xf17   :  { %1049 = vst.msk [vmem:[#allocation5 + $0x10] sm:$0xff] %vm69_vm0, %v1047_v5 }
 0xf1a   :  { %v823_v6 = vpop.permute.xlu1 %822  ;;  %v1282_v7 = vld [vmem:[#allocation5] sm:$0xff] }
 0xf1b   :  { %825 = vst.msk [vmem:[#allocation5 + $0x20] sm:$0xff] %vm69_vm0, %v823_v6  ;;  %2888 = vmatprep.mubr.msk.f32.mxu0 %vm69_vm0, %v1282_v7 }
 0xf1c   :  { %2889 = vmatmul.mubr.msk.f32.vlgmr.msra.gmra.mxu0 %vm69_vm0, %v1283_v50 }
 0xf1d   :  { %2921 = vmatpush3.msra.mxu0 %v1305_v62 }
 0xf1e   :  { %v599_v4 = vpop.permute.xlu1 %598  ;;  %v1284_v8 = vld [vmem:[#allocation5 + $0x10] sm:$0xff]  ;;  %2922 = vmatprep.subr.mxu0 %v3225_v3 }
 0xf1f   :  { %601 = vst.msk [vmem:[#allocation5 + $0x30] sm:$0xff] %vm69_vm0, %v599_v4  ;;  %2891 = vmatprep.mubr.msk.f32.mxu0 %vm69_vm0, %v1284_v8  ;;  %2923 = vmatpush3.msra.mxu0 %v1304_v13 }
 0xf20   :  { %2892 = vmatmul.mubr.msk.f32.gmra.mxu0 %vm69_vm0, %v1285_v57  ;;  %2924 = vmatprep.subr.mxu0 %v3225_v3 }
 0xf21   :  { %2925 = vmatpush3.msra.mxu0 %v1303_v11 }
 0xf22   :  { %v1286_v18 = vld [vmem:[#allocation5 + $0x20] sm:$0xff]  ;;  %2926 = vmatprep.subr.mxu0 %v3225_v3 }
 0xf23   :  { %2894 = vmatprep.mubr.msk.f32.mxu0 %vm69_vm0, %v1286_v18  ;;  %2927 = vmatpush3.msra.mxu0 %v1302_v47 }
 0xf24   :  { %2895 = vmatmul.mubr.msk.f32.gmra.mxu0 %vm69_vm0, %v1287_v52  ;;  %2942 = vmatprep.subr.mxu0 %v3225_v3 }
 0xf26   :  { %v1288_v12 = vld [vmem:[#allocation5 + $0x30] sm:$0xff] }
 0xf27   :  { %2897 = vmatprep.mubr.msk.f32.mxu0 %vm69_vm0, %v1288_v12 }
 0xf28   :  { %2898 = vmatmul.mubr.msk.f32.gmra.mxu0 %vm69_vm0, %v1289_v10 }
 0xf29   :  { %2928 = vmatprep.mubr.msk.f32.mxu0 %vm3228_vm2, %v3225_v3 }
 0xf2c   :  { %2929 = vmatmul.mubr.msk.f32.vlgmr.msra.gmra.mxu0 %vm69_vm0, %v1289_v10 }
 0xf2d   :  { %2943 = vmatpush3.msra.mxu0 %v3798_v0  ;;  %2950 = vmatprep.mubr.msk.f32.mxu0 %vm3228_vm2, %v3225_v3 }
 0xf2e   :  { %2944 = vmatprep.subr.mxu0 %v3225_v3 }
 0xf2f   :  { %2945 = vmatpush3.msra.mxu0 %v3804_v61 }
 0xf30   :  { %2946 = vmatprep.subr.mxu0 %v3225_v3 }
 0xf31   :  { %2947 = vmatpush3.msra.mxu0 %v3813_v45 }
 0xf32   :  { %2948 = vmatprep.subr.mxu0 %v3225_v3 }
 0xf33   :  { %2949 = vmatpush3.msra.mxu0 %v3820_v14 }
 0xf34   :  { %2951 = vmatmul.mubr.f32.vlgmr.msra.gmra.mxu0 %v3225_v3  ;;  %2964 = vmatprep.subr.mxu0 %v3225_v3 }
 0xf35   :  { %2965 = vmatpush3.msra.mxu0 %v3798_v0  ;;  %2972 = vmatprep.mubr.msk.f32.mxu0 %vm3228_vm2, %v3225_v3 }
 0xf36   :  { %2966 = vmatprep.subr.mxu0 %v3225_v3 }
 0xf37   :  { %2967 = vmatpush3.msra.mxu0 %v3804_v61 }
 0xf38   :  { %2968 = vmatprep.subr.mxu0 %v3225_v3 }
 0xf39   :  { %2969 = vmatpush3.msra.mxu0 %v3813_v45 }
 0xf3a   :  { %2970 = vmatprep.subr.mxu0 %v3225_v3 }
 0xf3b   :  { %2971 = vmatpush3.msra.mxu0 %v3820_v14 }
 0xf3c   :  { %2986 = vmatprep.subr.mxu0 %v3225_v3 }
 0xfdc   :  { %v3837_v59 = vpop.f32.mrf.mxu0 }
 0xfdd   :  { %v1531_v7 = vadd.f32 %v3849_v31, %v3837_v59 }
 0xfde   :  { %v1396_v56 = vpop.f32.mrf.mxu0 }
 0xfdf   :  { %v1526_v42 = vadd.f32 %v1525_v48, %v1396_v56  ;;  %v1572_v62 = vadd.f32 %v3858_v44, %v1531_v7 }
 0xfe0   :  { %v3839_v16 = vpop.f32.mrf.mxu0 }
 0xfe1   :  { %v1571_v25 = vadd.f32 %v3858_v44, %v1526_v42 }
 0xfe2   :  { %v3841_v17 = vpop.f32.mrf.mxu0 }
 0xfe4   :  { %v3843_v46 = vpop.f32.mrf.mxu0 }
 0xfe6   :  { %v3845_v49 = vpop.f32.mrf.mxu0 }
 0xfe8   :  { %v3847_v21 = vpop.f32.mrf.mxu0 }
 0xfea   :  { %v3851_v34 = vpop.f32.mrf.mxu0 }
 0xfec   :  { %v3853_v37 = vpop.f32.mrf.mxu0 }
 0xfee   :  { %v2930_v53 = vpop.f32.mrf.mxu0 }
 0xff4   :  { %v1799_v55 = vpop.f32.mrf.mxu0 }
 0xff5   :  { %v1803_v15 = vadd.f32 %v1799_v55, %v1571_v25  ;;  %v1536_v25 = vadd.f32 %v1535_v36, %v3841_v17 }
 0xff6   :  { %v2952_v58 = vpop.f32.mrf.mxu0 }
 0xff7   :  { %3153 = vtanh.f32 %v1803_v15  ;;  %v2777_v28 = vmul.f32 -1.442695, %v1803_v15  ;;  %v1573_v55 = vadd.f32 %v3858_v44, %v1536_v25 }
 0xff9   :  { %3155 = vpow2.f32 %v2777_v28 }
0x1004   :  { %v3154_v40 = vpop.eup %3153 }
0x1005   :  { %1813 = vrot.lane.b32.xlu1 %v3154_v40, %s3226_s3 }
0x1006   :  { %v3156_v2 = vpop.eup %3155 }
0x1007   :  { %v1807_v19 = vadd.f32 1.0, %v3156_v2 }
0x1009   :  { %3157 = vrcp.f32 %v1807_v19 }
0x1016   :  { %v3158_v23 = vpop.eup %3157 }
0x1017   :  { %v1811_v27 = vmul.f32 0.0, %v3158_v23 }
0x1077   :  { %v1814_v24 = vpop.permute.xlu1 %1813 }
0x1078   :  { %v1816_v54 = vmul.f32 %v3158_v23, %v1814_v24 }
0x107a   :  { %1818 = vrot.lane.b32.xlu0 %v1816_v54, %s3227_s13 }
0x107e   :  { %1266 = vrot.lane.b32.xlu0 %v3755_v63, %s3226_s3 }
0x10ec   :  { %v1819_v29 = vpop.permute.xlu0 %1818 }
0x10ed   :  { %v1821_v30 = vadd.f32 %v1819_v29, %v1811_v27 }
0x10ef   :  { %3159 = vtanh.f32 %v1821_v30 }
0x10f0   :  { %v1267_v32 = vpop.permute.xlu0 %1266 }
0x10f1   :  { %1269 = vst.msk [vmem:[#allocation4 + $0x38] sm:$0xff] %vm69_vm0, %v1267_v32  ;;  %v1541_v32 = vadd.f32 %v3898_v35, %v3839_v16 }
0x10f8   :  { %v1281_v1 = vld [vmem:[#allocation4 + $0x38] sm:$0xff] }
0x10f9   :  { %2918 = vmatmul.mubr.msk.f32.gmra.mxu1 %vm69_vm0, %v1281_v1 }
0x10fa   :  { %2939 = vmatprep.mubr.msk.f32.mxu1 %vm3228_vm2, %v3225_v3 }
0x10fc   :  { %v3160_v43 = vpop.eup %3159 }
0x10fd   :  { %2940 = vmatmul.mubr.msk.f32.vlgmr.msra.gmra.mxu1 %vm69_vm0, %v1281_v1  ;;  %1824 = vrot.lane.b32.xlu1 %v3160_v43, %s3226_s3  ;;  %v1574_v1 = vadd.f32 %v3858_v44, %v1541_v32 }
0x10fe   :  { %2954 = vmatpush3.msra.mxu1 %v3798_v0  ;;  %2961 = vmatprep.mubr.msk.f32.mxu1 %vm3228_vm2, %v3225_v3 }
0x10ff   :  { %2955 = vmatprep.subr.mxu1 %v3225_v3 }
0x1100   :  { %2956 = vmatpush3.msra.mxu1 %v3804_v61 }
0x1101   :  { %2957 = vmatprep.subr.mxu1 %v3225_v3 }
0x1102   :  { %2958 = vmatpush3.msra.mxu1 %v3813_v45 }
0x1103   :  { %2959 = vmatprep.subr.mxu1 %v3225_v3 }
0x1104   :  { %2960 = vmatpush3.msra.mxu1 %v3820_v14 }
0x1105   :  { %2975 = vmatprep.subr.mxu1 %v3225_v3 }
0x116f   :  { %v1825_v60 = vpop.permute.xlu1 %1824 }
0x1170   :  { %v1827_v33 = vmul.f32 %v3158_v23, %v1825_v60 }
0x1172   :  { %1829 = vrot.lane.b32.xlu1 %v1827_v33, %s3227_s13 }
0x11b9   :  { %v3904_v41 = vpop.f32.mrf.mxu1 }
0x11bb   :  { %v3906_v63 = vpop.f32.mrf.mxu1 }
0x11bd   :  { %v3908_v51 = vpop.f32.mrf.mxu1 }
0x11bf   :  { %v2941_v5 = vpop.f32.mrf.mxu1 }
0x11e4   :  { %v1830_v6 = vpop.permute.xlu1 %1829 }
0x11e5   :  { %2962 = vmatmul.mubr.msk.f32.vlgmr.msra.gmra.mxu1 %vm69_vm0, %v1830_v6 }
0x11e6   :  { %2976 = vmatpush3.msra.mxu1 %v3798_v0  ;;  %2983 = vmatprep.mubr.msk.f32.mxu1 %vm3228_vm2, %v3225_v3 }
0x11e7   :  { %2977 = vmatprep.subr.mxu1 %v3225_v3 }
0x11e8   :  { %2978 = vmatpush3.msra.mxu1 %v3804_v61 }
0x11e9   :  { %2979 = vmatprep.subr.mxu1 %v3225_v3 }
0x11ea   :  { %2980 = vmatpush3.msra.mxu1 %v3813_v45 }
0x11eb   :  { %2981 = vmatprep.subr.mxu1 %v3225_v3 }
0x11ec   :  { %2982 = vmatpush3.msra.mxu1 %v3820_v14 }
0x11ed   :  { %2997 = vmatprep.subr.mxu1 %v3225_v3 }
0x12a5   :  { %v1899_v50 = vpop.f32.mrf.mxu1 }
0x12a6   :  { %v1903_v13 = vadd.f32 %v1899_v50, %v1572_v62 }
0x12a7   :  { %v2963_v4 = vpop.f32.mrf.mxu1 }
0x12a8   :  { %3161 = vtanh.f32 %v1903_v13  ;;  %v2779_v11 = vmul.f32 -1.442695, %v1903_v13 }
0x12aa   :  { %3163 = vpow2.f32 %v2779_v11 }
0x12b5   :  { %v3162_v8 = vpop.eup %3161 }
0x12b6   :  { %1913 = vrot.lane.b32.xlu0 %v3162_v8, %s3226_s3 }
0x12b7   :  { %v3164_v57 = vpop.eup %3163 }
0x12b8   :  { %v1907_v47 = vadd.f32 1.0, %v3164_v57 }
0x12ba   :  { %3165 = vrcp.f32 %v1907_v47 }
0x12c7   :  { %v3166_v18 = vpop.eup %3165 }
0x12c8   :  { %v1911_v10 = vmul.f32 %v3166_v18, %v1821_v30 }
0x1328   :  { %v1914_v52 = vpop.permute.xlu0 %1913 }
0x1329   :  { %v1916_v12 = vmul.f32 %v3166_v18, %v1914_v52 }
0x132b   :  { %1918 = vrot.lane.b32.xlu1 %v1916_v12, %s3227_s13 }
0x139d   :  { %v1919_v59 = vpop.permute.xlu1 %1918 }
0x139e   :  { %v1921_v56 = vadd.f32 %v1919_v59, %v1911_v10 }
0x13a0   :  { %3167 = vtanh.f32 %v1921_v56 }
0x13ad   :  { %v3168_v31 = vpop.eup %3167 }
0x13ae   :  { %1924 = vrot.lane.b32.xlu0 %v3168_v31, %s3226_s3 }
0x1420   :  { %v1925_v48 = vpop.permute.xlu0 %1924 }
0x1421   :  { %v1927_v53 = vmul.f32 %v3166_v18, %v1925_v48  ;;  %v1546_v18 = vadd.f32 %v3902_v39, %v3845_v49 }
0x1423   :  { %1929 = vrot.lane.b32.xlu1 %v1927_v53, %s3227_s13  ;;  %v1575_v52 = vadd.f32 %v3858_v44, %v1546_v18  ;;  %v1716_v18 = vadd.f32 %v3908_v51, %v3853_v37 }
0x1495   :  { %v1930_v42 = vpop.permute.xlu1 %1929 }
0x1496   :  { %2973 = vmatmul.mubr.msk.f32.vlgmr.msra.gmra.mxu0 %vm69_vm0, %v1930_v42 }
0x1497   :  { %2987 = vmatpush3.msra.mxu0 %v3798_v0  ;;  %2994 = vmatprep.mubr.msk.f32.mxu0 %vm3228_vm2, %v3225_v3 }
0x1498   :  { %2988 = vmatprep.subr.mxu0 %v3225_v3 }
0x1499   :  { %2989 = vmatpush3.msra.mxu0 %v3804_v61 }
0x149a   :  { %2990 = vmatprep.subr.mxu0 %v3225_v3 }
0x149b   :  { %2991 = vmatpush3.msra.mxu0 %v3813_v45 }
0x149c   :  { %2992 = vmatprep.subr.mxu0 %v3225_v3 }
0x149d   :  { %2993 = vmatpush3.msra.mxu0 %v3820_v14 }
0x149e   :  { %3008 = vmatprep.subr.mxu0 %v3225_v3 }
0x1556   :  { %v1999_v15 = vpop.f32.mrf.mxu0 }
0x1557   :  { %v2003_v58 = vadd.f32 %v1999_v15, %v1573_v55 }
0x1558   :  { %v2974_v40 = vpop.f32.mrf.mxu0 }
0x1559   :  { %3169 = vtanh.f32 %v2003_v58  ;;  %v2781_v2 = vmul.f32 -1.442695, %v2003_v58 }
0x155b   :  { %3171 = vpow2.f32 %v2781_v2 }
0x1566   :  { %v3170_v28 = vpop.eup %3169 }
0x1567   :  { %2013 = vrot.lane.b32.xlu0 %v3170_v28, %s3226_s3 }
0x1568   :  { %v3172_v19 = vpop.eup %3171 }
0x1569   :  { %v2007_v20 = vadd.f32 1.0, %v3172_v19 }
0x156b   :  { %3173 = vrcp.f32 %v2007_v20 }
0x1578   :  { %v3174_v22 = vpop.eup %3173 }
0x1579   :  { %v2011_v17 = vmul.f32 %v3174_v22, %v1921_v56 }
0x15d9   :  { %v2014_v23 = vpop.permute.xlu0 %2013 }
0x15da   :  { %v2016_v24 = vmul.f32 %v3174_v22, %v2014_v23 }
0x15dc   :  { %2018 = vrot.lane.b32.xlu1 %v2016_v24, %s3227_s13 }
0x164e   :  { %v2019_v54 = vpop.permute.xlu1 %2018 }
0x164f   :  { %v2021_v9 = vadd.f32 %v2019_v54, %v2011_v17 }
0x1651   :  { %3175 = vtanh.f32 %v2021_v9 }
0x165e   :  { %v3176_v26 = vpop.eup %3175 }
0x165f   :  { %2024 = vrot.lane.b32.xlu0 %v3176_v26, %s3226_s3 }
0x16d1   :  { %v2025_v27 = vpop.permute.xlu0 %2024 }
0x16d2   :  { %v2027_v29 = vmul.f32 %v3174_v22, %v2025_v27 }
0x16d4   :  { %2029 = vrot.lane.b32.xlu1 %v2027_v29, %s3227_s13 }
0x1746   :  { %v2030_v30 = vpop.permute.xlu1 %2029 }
0x1747   :  { %2984 = vmatmul.mubr.msk.f32.vlgmr.msra.gmra.mxu1 %vm69_vm0, %v2030_v30 }
0x1748   :  { %2998 = vmatpush3.msra.mxu1 %v3798_v0  ;;  %3005 = vmatprep.mubr.msk.f32.mxu1 %vm3228_vm2, %v3225_v3 }
0x1749   :  { %2999 = vmatprep.subr.mxu1 %v3225_v3 }
0x174a   :  { %3000 = vmatpush3.msra.mxu1 %v3804_v61 }
0x174b   :  { %3001 = vmatprep.subr.mxu1 %v3225_v3 }
0x174c   :  { %3002 = vmatpush3.msra.mxu1 %v3813_v45 }
0x174d   :  { %3003 = vmatprep.subr.mxu1 %v3225_v3 }
0x174e   :  { %3004 = vmatpush3.msra.mxu1 %v3820_v14 }
0x174f   :  { %3019 = vmatprep.subr.mxu1 %v3225_v3 }
0x1807   :  { %v2099_v43 = vpop.f32.mrf.mxu1 }
0x1808   :  { %v2103_v60 = vadd.f32 %v2099_v43, %v1574_v1  ;;  %v1556_v1 = vadd.f32 %v3906_v63, %v3851_v34 }
0x1809   :  { %v2985_v33 = vpop.f32.mrf.mxu1 }
0x180a   :  { %3177 = vtanh.f32 %v2103_v60  ;;  %v2783_v5 = vmul.f32 -1.442695, %v2103_v60  ;;  %v1577_v43 = vadd.f32 %v3858_v44, %v1556_v1 }
0x180c   :  { %3179 = vpow2.f32 %v2783_v5 }
0x1817   :  { %v3178_v36 = vpop.eup %3177 }
0x1818   :  { %2113 = vrot.lane.b32.xlu0 %v3178_v36, %s3226_s3 }
0x1819   :  { %v3180_v6 = vpop.eup %3179 }
0x181a   :  { %v2107_v7 = vadd.f32 1.0, %v3180_v6 }
0x181c   :  { %3181 = vrcp.f32 %v2107_v7 }
0x1829   :  { %v3182_v62 = vpop.eup %3181 }
0x182a   :  { %v2111_v16 = vmul.f32 %v3182_v62, %v2021_v9 }
0x188a   :  { %v2114_v50 = vpop.permute.xlu0 %2113 }
0x188b   :  { %v2116_v13 = vmul.f32 %v3182_v62, %v2114_v50 }
0x188d   :  { %2118 = vrot.lane.b32.xlu1 %v2116_v13, %s3227_s13 }
0x18ff   :  { %v2119_v35 = vpop.permute.xlu1 %2118 }
0x1900   :  { %v2121_v4 = vadd.f32 %v2119_v35, %v2111_v16 }
0x1902   :  { %3183 = vtanh.f32 %v2121_v4 }
0x190f   :  { %v3184_v8 = vpop.eup %3183 }
0x1910   :  { %2124 = vrot.lane.b32.xlu0 %v3184_v8, %s3226_s3 }
0x1982   :  { %v2125_v11 = vpop.permute.xlu0 %2124 }
0x1983   :  { %v2127_v57 = vmul.f32 %v3182_v62, %v2125_v11 }
0x1985   :  { %2129 = vrot.lane.b32.xlu1 %v2127_v57, %s3227_s13 }
0x19f7   :  { %v2130_v47 = vpop.permute.xlu1 %2129 }
0x19f8   :  { %2995 = vmatmul.mubr.msk.f32.vlgmr.msra.gmra.mxu0 %vm69_vm0, %v2130_v47  ;;  %v1561_v47 = vadd.f32 %v3904_v41, %v3847_v21 }
0x19f9   :  { %3009 = vmatpush3.msra.mxu0 %v3798_v0  ;;  %3016 = vmatprep.mubr.msk.f32.mxu0 %vm3228_vm2, %v3225_v3 }
0x19fa   :  { %3010 = vmatprep.subr.mxu0 %v3225_v3 }
0x19fb   :  { %3011 = vmatpush3.msra.mxu0 %v3804_v61 }
0x19fc   :  { %3012 = vmatprep.subr.mxu0 %v3225_v3 }
0x19fd   :  { %3013 = vmatpush3.msra.mxu0 %v3813_v45 }
0x19fe   :  { %3014 = vmatprep.subr.mxu0 %v3225_v3 }
0x19ff   :  { %3015 = vmatpush3.msra.mxu0 %v3820_v14 }
0x1a00   :  { %3030 = vmatprep.subr.mxu0 %v3225_v3 }
0x1ab8   :  { %v2199_v12 = vpop.f32.mrf.mxu0 }
0x1ab9   :  { %v2203_v10 = vadd.f32 %v2199_v12, %v1575_v52  ;;  %v1578_v52 = vadd.f32 %v3858_v44, %v1561_v47  ;;  %v2776_v12 = vld [vmem:[%s4073_s9] ss:$0 sm:$0xff] }
0x1aba   :  { %v2996_v59 = vpop.f32.mrf.mxu0 }
0x1abb   :  { %3185 = vtanh.f32 %v2203_v10  ;;  %v2785_v31 = vmul.f32 -1.442695, %v2203_v10 }
0x1abd   :  { %3187 = vpow2.f32 %v2785_v31  ;;  %v1726_v31 = vadd.f32 %v2776_v12, %v1716_v18 }
0x1abf   :  { %v2792_v37 = vmul.f32 -1.442695, %v1726_v31 }
0x1ac8   :  { %v3186_v56 = vpop.eup %3185 }
0x1ac9   :  { %2213 = vrot.lane.b32.xlu0 %v3186_v56, %s3226_s3 }
0x1aca   :  { %v3188_v48 = vpop.eup %3187 }
0x1acb   :  { %v2207_v53 = vadd.f32 1.0, %v3188_v48 }
0x1acd   :  { %3189 = vrcp.f32 %v2207_v53 }
0x1ada   :  { %v3190_v42 = vpop.eup %3189 }
0x1adb   :  { %v2211_v49 = vmul.f32 %v3190_v42, %v2121_v4 }
0x1b3b   :  { %v2214_v25 = vpop.permute.xlu0 %2213 }
0x1b3c   :  { %v2216_v55 = vmul.f32 %v3190_v42, %v2214_v25 }
0x1b3e   :  { %2218 = vrot.lane.b32.xlu1 %v2216_v55, %s3227_s13 }
0x1bb0   :  { %v2219_v39 = vpop.permute.xlu1 %2218 }
0x1bb1   :  { %v2221_v15 = vadd.f32 %v2219_v39, %v2211_v49 }
0x1bb3   :  { %3191 = vtanh.f32 %v2221_v15 }
0x1bc0   :  { %v3192_v58 = vpop.eup %3191 }
0x1bc1   :  { %2224 = vrot.lane.b32.xlu0 %v3192_v58, %s3226_s3 }
0x1c33   :  { %v2225_v40 = vpop.permute.xlu0 %2224 }
0x1c34   :  { %v2227_v28 = vmul.f32 %v3190_v42, %v2225_v40  ;;  %v2553_v40 = vld [vmem:[%s4074_s10 + $0x38] sm:$0xff] }
0x1c36   :  { %2229 = vrot.lane.b32.xlu1 %v2227_v28, %s3227_s13  ;;  %v2552_v28 = vld [vmem:[%s4074_s10 + $0x30] sm:$0xff] }
0x1ca8   :  { %v2230_v2 = vpop.permute.xlu1 %2229 }
0x1ca9   :  { %3006 = vmatmul.mubr.msk.f32.vlgmr.msra.gmra.mxu1 %vm69_vm0, %v2230_v2 }
0x1caa   :  { %3020 = vmatpush3.msra.mxu1 %v3798_v0  ;;  %3027 = vmatprep.mubr.msk.f32.mxu1 %vm3228_vm2, %v3225_v3  ;;  %v1551_v0 = vadd.f32 %v3900_v38, %v3843_v46 }
0x1cab   :  { %3021 = vmatprep.subr.mxu1 %v3225_v3 }
0x1cac   :  { %3022 = vmatpush3.msra.mxu1 %v3804_v61  ;;  %v1576_v19 = vadd.f32 %v3858_v44, %v1551_v0 }
0x1cad   :  { %3023 = vmatprep.subr.mxu1 %v3225_v3 }
0x1cae   :  { %3024 = vmatpush3.msra.mxu1 %v3813_v45 }
0x1caf   :  { %3025 = vmatprep.subr.mxu1 %v3225_v3 }
0x1cb0   :  { %3026 = vmatpush3.msra.mxu1 %v3820_v14 }
0x1cb1   :  { %3041 = vmatprep.subr.mxu1 %v3225_v3 }
0x1d69   :  { %v2299_v20 = vpop.f32.mrf.mxu1 }
0x1d6a   :  { %v2303_v22 = vadd.f32 %v2299_v20, %v1576_v19 }
0x1d6b   :  { %v3007_v23 = vpop.f32.mrf.mxu1 }
0x1d6c   :  { %3193 = vtanh.f32 %v2303_v22  ;;  %v2787_v24 = vmul.f32 -1.442695, %v2303_v22  ;;  %v2551_v22 = vld [vmem:[%s4074_s10 + $0x28] sm:$0xff]  ;;  %v2550_v23 = vld [vmem:[%s4074_s10 + $0x20] sm:$0xff] }
0x1d6e   :  { %3195 = vpow2.f32 %v2787_v24  ;;  %v2548_v24 = vld [vmem:[%s4074_s10 + $0x10] sm:$0xff] }
0x1d79   :  { %v3194_v61 = vpop.eup %3193 }
0x1d7a   :  { %2313 = vrot.lane.b32.xlu0 %v3194_v61, %s3226_s3  ;;  %v2549_v61 = vld [vmem:[%s4074_s10 + $0x18] sm:$0xff] }
0x1d7b   :  { %v3196_v45 = vpop.eup %3195 }
0x1d7c   :  { %v2307_v17 = vadd.f32 1.0, %v3196_v45  ;;  %v2547_v45 = vld [vmem:[%s4074_s10 + $0x8] sm:$0xff] }
0x1d7e   :  { %3197 = vrcp.f32 %v2307_v17  ;;  %v2546_v17 = vld [vmem:[%s4074_s10] sm:$0xff] }
0x1d8b   :  { %v3198_v14 = vpop.eup %3197 }
0x1d8c   :  { %v2311_v46 = vmul.f32 %v3198_v14, %v2221_v15 }
0x1dec   :  { %v2314_v54 = vpop.permute.xlu0 %2313 }
0x1ded   :  { %v2316_v9 = vmul.f32 %v3198_v14, %v2314_v54 }
0x1def   :  { %2318 = vrot.lane.b32.xlu1 %v2316_v9, %s3227_s13 }
0x1e61   :  { %v2319_v38 = vpop.permute.xlu1 %2318 }
0x1e62   :  { %v2321_v26 = vadd.f32 %v2319_v38, %v2311_v46 }
0x1e64   :  { %3199 = vtanh.f32 %v2321_v26 }
0x1e71   :  { %v3200_v27 = vpop.eup %3199 }
0x1e72   :  { %2324 = vrot.lane.b32.xlu0 %v3200_v27, %s3226_s3 }
0x1ee4   :  { %v2325_v29 = vpop.permute.xlu0 %2324 }
0x1ee5   :  { %v2327_v30 = vmul.f32 %v3198_v14, %v2325_v29 }
0x1ee7   :  { %2329 = vrot.lane.b32.xlu1 %v2327_v30, %s3227_s13 }
0x1f59   :  { %v2330_v32 = vpop.permute.xlu1 %2329 }
0x1f5a   :  { %3017 = vmatmul.mubr.msk.f32.vlgmr.msra.gmra.mxu0 %vm69_vm0, %v2330_v32  ;;  %v2795_v32 = vld [vmem:[%s4075_s11] ss:$0 sm:$0xff] }
0x1f5b   :  { %3038 = vmatprep.mubr.msk.f32.mxu0 %vm3228_vm2, %v3225_v3  ;;  %3031 = vmatpush3.msra.mxu0 %v2553_v40 }
0x1f5c   :  { %3032 = vmatprep.subr.mxu0 %v3225_v3 }
0x1f5d   :  { %3033 = vmatpush3.msra.mxu0 %v2552_v28 }
0x1f5e   :  { %3034 = vmatprep.subr.mxu0 %v3225_v3 }
0x1f5f   :  { %3035 = vmatpush3.msra.mxu0 %v2551_v22 }
0x1f60   :  { %3036 = vmatprep.subr.mxu0 %v3225_v3 }
0x1f61   :  { %3037 = vmatpush3.msra.mxu0 %v2550_v23 }
0x201a   :  { %v2399_v60 = vpop.f32.mrf.mxu0 }
0x201b   :  { %v2403_v33 = vadd.f32 %v2399_v60, %v1577_v43 }
0x201c   :  { %v3018_v36 = vpop.f32.mrf.mxu0 }
0x201d   :  { %3201 = vtanh.f32 %v2403_v33  ;;  %v2789_v6 = vmul.f32 -1.442695, %v2403_v33 }
0x201f   :  { %3203 = vpow2.f32 %v2789_v6 }
0x202a   :  { %v3202_v5 = vpop.eup %3201 }
0x202b   :  { %2413 = vrot.lane.b32.xlu0 %v3202_v5, %s3226_s3 }
0x202c   :  { %v3204_v7 = vpop.eup %3203 }
0x202d   :  { %v2407_v62 = vadd.f32 1.0, %v3204_v7 }
0x202f   :  { %3205 = vrcp.f32 %v2407_v62 }
0x203c   :  { %v3206_v50 = vpop.eup %3205 }
0x203d   :  { %v2411_v34 = vmul.f32 %v3206_v50, %v2321_v26 }
0x209d   :  { %v2414_v13 = vpop.permute.xlu0 %2413 }
0x209e   :  { %v2416_v16 = vmul.f32 %v3206_v50, %v2414_v13 }
0x20a0   :  { %2418 = vrot.lane.b32.xlu1 %v2416_v16, %s3227_s13 }
0x2112   :  { %v2419_v63 = vpop.permute.xlu1 %2418 }
0x2113   :  { %v2421_v35 = vadd.f32 %v2419_v63, %v2411_v34 }
0x2115   :  { %3207 = vtanh.f32 %v2421_v35 }
0x2122   :  { %v3208_v4 = vpop.eup %3207 }
0x2123   :  { %2424 = vrot.lane.b32.xlu0 %v3208_v4, %s3226_s3 }
0x2195   :  { %v2425_v8 = vpop.permute.xlu0 %2424 }
0x2196   :  { %v2427_v11 = vmul.f32 %v3206_v50, %v2425_v8 }
0x2198   :  { %2429 = vrot.lane.b32.xlu1 %v2427_v11, %s3227_s13 }
0x220a   :  { %v2430_v57 = vpop.permute.xlu1 %2429 }
0x220b   :  { %3028 = vmatmul.mubr.msk.f32.vlgmr.msra.gmra.mxu1 %vm69_vm0, %v2430_v57 }
0x220c   :  { %3049 = vmatprep.mubr.msk.f32.mxu1 %vm3228_vm2, %v3225_v3  ;;  %3042 = vmatpush3.msra.mxu1 %v2549_v61 }
0x220d   :  { %3043 = vmatprep.subr.mxu1 %v3225_v3 }
0x220e   :  { %3044 = vmatpush3.msra.mxu1 %v2548_v24 }
0x220f   :  { %3045 = vmatprep.subr.mxu1 %v3225_v3 }
0x2210   :  { %3046 = vmatpush3.msra.mxu1 %v2547_v45 }
0x2211   :  { %3047 = vmatprep.subr.mxu1 %v3225_v3 }
0x2212   :  { %3048 = vmatpush3.msra.mxu1 %v2546_v17 }
0x22cb   :  { %v2499_v10 = vpop.f32.mrf.mxu1 }
0x22cc   :  { %v2503_v59 = vadd.f32 %v2499_v10, %v1578_v52 }
0x22cd   :  { %v3029_v56 = vpop.f32.mrf.mxu1 }
0x22ce   :  { %3209 = vtanh.f32 %v2503_v59  ;;  %v2791_v21 = vmul.f32 -1.442695, %v2503_v59 }
0x22cf   :  { %3211 = vtanh.f32 %v1726_v31 }
0x22d0   :  { %3213 = vpow2.f32 %v2791_v21 }
0x22d1   :  { %3215 = vpow2.f32 %v2792_v37 }
0x22db   :  { %v3210_v48 = vpop.eup %3209 }
0x22dc   :  { %2513 = vrot.lane.b32.xlu0 %v3210_v48, %s3226_s3  ;;  %v3212_v53 = vpop.eup %3211 }
0x22dd   :  { %v3214_v44 = vpop.eup %3213 }
0x22de   :  { %v2507_v41 = vadd.f32 1.0, %v3214_v44  ;;  %v3216_v51 = vpop.eup %3215 }
0x22df   :  { %v2531_v42 = vadd.f32 1.0, %v3216_v51 }
0x22e0   :  { %2536 = vrot.lane.b32.xlu0 %v3212_v53, %s3226_s3  ;;  %3217 = vrcp.f32 %v2507_v41 }
0x22e1   :  { %3219 = vrcp.f32 %v2531_v42 }
0x22ed   :  { %v3218_v25 = vpop.eup %3217 }
0x22ee   :  { %v3220_v39 = vpop.eup %3219  ;;  %v2511_v0 = vmul.f32 %v3218_v25, %v2421_v35 }
0x234e   :  { %v2514_v55 = vpop.permute.xlu0 %2513 }
0x234f   :  { %v2516_v49 = vmul.f32 %v3218_v25, %v2514_v55 }
0x2351   :  { %2518 = vrot.lane.b32.xlu1 %v2516_v49, %s3227_s13 }
0x2352   :  { %v2537_v15 = vpop.permute.xlu0 %2536 }
0x2353   :  { %v2539_v58 = vmul.f32 %v3220_v39, %v2537_v15 }
0x2355   :  { %3221 = vtanh.f32 %v2539_v58 }
0x2362   :  { %v3222_v2 = vpop.eup %3221 }
0x2363   :  { %2542 = vrot.lane.b32.xlu0 %v3222_v2, %s3229_s23 }
0x23c3   :  { %v2519_v19 = vpop.permute.xlu1 %2518 }
0x23c4   :  { %v2521_v20 = vadd.f32 %v2519_v19, %v2511_v0 }
0x23c6   :  { %3223 = vtanh.f32 %v2521_v20 }
0x23d3   :  { %v3224_v14 = vpop.eup %3223 }
0x23d4   :  { %2524 = vrot.lane.b32.xlu1 %v3224_v14, %s3226_s3 }
0x23d5   :  { %v2543_v54 = vpop.permute.xlu0 %2542 }
0x23d6   :  { %v2545_v9 = vmul.f32 %v3220_v39, %v2543_v54 }
0x23d8   :  { %2555 = vrot.lane.b32.xlu1 %v2545_v9, %s3227_s13 }
0x2446   :  { %v2525_v46 = vpop.permute.xlu1 %2524 }
0x2447   :  { %v2527_v38 = vmul.f32 %v3218_v25, %v2525_v46 }
0x2449   :  { %2630 = vrot.lane.b32.xlu0 %v2527_v38, %s3227_s13 }
0x244a   :  { %v2556_v26 = vpop.permute.xlu1 %2555 }
0x244b   :  { %3039 = vmatmul.mubr.msk.f32.vlgmr.msra.gmra.mxu0 %vm69_vm0, %v2556_v26 }
0x24bb   :  { %v2631_v27 = vpop.permute.xlu0 %2630 }
0x24bc   :  { %3050 = vmatmul.mubr.msk.f32.vlgmr.msra.gmra.mxu1 %vm69_vm0, %v2631_v27 }
0x250b   :  { %v2625_v29 = vpop.f32.mrf.mxu0 }
0x250d   :  { %v3040_v3 = vpop.f32.mrf.mxu0 }
0x257c   :  { %v2700_v30 = vpop.f32.mrf.mxu1 }
0x257d   :  { %v2701_v1 = vadd.f32 %v2700_v30, %v2625_v29 }
0x257e   :  { %v3051_v43 = vpop.f32.mrf.mxu1 }
0x257f   :  { %v2711_v60 = vadd.f32 %v2795_v32, %v2701_v1 }
0x2581   :  { %2713 = vst.msk [vmem:[%s4076_s12] sm:$0xff] %vm2712_vm3, %v2711_v60 }

</bundles_post_ra>
